<compile_context>
chip_gen: v6e
topology: v6e:2x2x1
jax: 0.10.0
libtpu: 0.0.40
codegen_flags: <defaults>
</compile_context>

<pallas_src>
import jax
import jax.numpy as jnp
from jax.experimental import pallas as pl
from jax.experimental.pallas import tpu as pltpu


def _vmem_capacity_bytes():
    try:
        return int(pltpu.get_tpu_info().vmem_capacity_bytes)
    except Exception:
        return 64 * 1024 * 1024          # safe default (v7x per-core VMEM)


def _tile_bytes_estimate(TH, W, C, G, K, out_itemsize):
    """Rough per-grid-step VMEM working set for row-tile height TH."""
    KK = K * K
    GKK = G * KK
    KKC = KK * C
    p = K // 2
    THp = TH + 2 * p
    THW = TH * W
    b_in = 2 * (K * C * THp * W * 2)            # double-buffered bf16 kj windows
    b_out = 2 * (C * THW * out_itemsize)        # double-buffered output tile
    b_const = 2 * (GKK * KKC * 2 + GKK * 4)     # weight + shift (double-buffered)
    b_work = (KKC * THW * 2                     # pf (bf16)
              + 3 * KKC * THW * 4               # eb / weighted / promoted pf (f32)
              + 2 * GKK * THW * 4               # z, e (f32)
              + 3 * C * THW * 4                 # acc / out temporaries
              + 4 * THW * 4)                    # row statistics
    return b_in + b_out + b_const + int(1.25 * b_work)


def _pick_row_tile(H, W, C, G, K, out_itemsize, vmem_cap, N, max_lanes=2048):
    """Largest row-tile height TH (divisor of H) with lane-dense TH*W
    (multiple of 128), capped by a VMEM-derived budget; only prefer >=2 row
    tiles when the batch alone cannot feed both TensorCores (N == 1)."""
    budget = int(0.45 * vmem_cap)
    cands = [th for th in range(1, H + 1)
             if H % th == 0
             and (th * W) % 128 == 0
             and th * W <= max_lanes
             and _tile_bytes_estimate(th, W, C, G, K, out_itemsize) <= budget]
    if not cands:
        return H                                 # whole image; block == full dims
    if N == 1:
        multi = [th for th in cands if H // th >= 2]
        if multi:
            cands = multi
    return max(cands)


def anti_alias_filter_pallas(x, conv_w, gamma, beta, run_mean, run_var, *,
                             kernel_size=3, groups=8, eps=1e-5,
                             out_dtype=jnp.float32):
    N, C, H, W = x.shape
    K = kernel_size
    KK = K * K
    G = groups
    Cg = C // G
    GKK = G * KK
    p = K // 2

    out_itemsize = jnp.dtype(out_dtype).itemsize
    vmem_cap = _vmem_capacity_bytes()
    TH = _pick_row_tile(H, W, C, G, K, out_itemsize, vmem_cap, N)
    nH = H // TH
    THp = TH + 2 * p                   # row-tile height incl. halo
    THW = TH * W                       # lane width of one spatial tile
    THpW = THp * W                     # lane width of one halo window

    # ---- XLA glue (cheap) ----
    # Reflection pad, then K column(kj)-shifted bf16 copies with the spatial
    # dims flattened to a lane-dense axis per overlapping row-tile window:
    # ~K*(TH+2p)/TH x bf16 duplication of the input (vs. the old 9x f32 im2col).
    # TODO(synk): for very large inputs, pass xpad with memory_space=pl.ANY and
    # double-buffer the halo windows with pltpu.make_async_copy instead of
    # materializing xwin in HBM.
    xpad = jnp.pad(x, ((0, 0), (0, 0), (p, p), (p, p)), mode="reflect")
    xpad = xpad.astype(jnp.bfloat16)                                 # halve input DMA bytes
    xkj = jnp.stack([xpad[:, :, :, kj:kj + W] for kj in range(K)], axis=1)   # (N,K,C,Hp,W)
    xwin = jnp.stack([xkj[:, :, :, h * TH:h * TH + THp, :] for h in range(nH)],
                     axis=1)                                          # (N,nH,K,C,THp,W)
    xwin = xwin.reshape(N, nH, K, C, THpW)

    # Inference-mode BatchNorm folded into the conv weight (scale) + shift.
    # TODO(synk): training-mode batch statistics would need a cross-batch
    # reduction pass; this implements eval-mode (running-stats) BN only.
    inv_std = 1.0 / jnp.sqrt(run_var.astype(jnp.float32) + eps)
    scale = gamma.astype(jnp.float32) * inv_std                       # (GKK,)
    shift = beta.astype(jnp.float32) - run_mean.astype(jnp.float32) * scale

    # Block-diagonal grouped-conv weight (BN scale folded in); columns ordered
    # tap-major (col = k*C + channel) to match the in-kernel tap concatenation.
    wflat = conv_w.reshape(GKK, Cg, KK).astype(jnp.float32) * scale[:, None, None]
    o_idx = jnp.arange(GKK)
    rows = o_idx[:, None, None]                                       # (GKK,1,1)
    cols = (jnp.arange(KK)[None, None, :] * C
            + (o_idx // KK)[:, None, None] * Cg
            + jnp.arange(Cg)[None, :, None])                          # (GKK,Cg,KK)
    wbd = jnp.zeros((GKK, KK * C), jnp.float32).at[rows, cols].set(wflat)

    # Permute rows from conv channel order o = g*KK + k to (tap k, group g)
    # order r = k*G + g.  Softmax over all GKK rows is order-invariant, and
    # this makes the softmax-row -> channel-row broadcast a plain broadcast
    # (no one-hot expand / sum matmuls and no transposes in the kernel).
    perm = (jnp.arange(GKK) % G) * KK + (jnp.arange(GKK) // G)
    wbd = wbd[perm].astype(jnp.bfloat16)                              # (GKK, KK*C)
    bshift = shift[perm].reshape(GKK, 1).astype(jnp.float32)

    def kernel(x_ref, w_ref, b_ref, o_ref):
        # x_ref : (1, 1, K, C, THpW) bf16  kj-shifted, row-flattened halo windows
        # w_ref : (GKK, KK*C)        bf16  block-diag conv weight (BN scale folded)
        # b_ref : (GKK, 1)           f32   BN shift, row order r = k*G + g
        # o_ref : (1, C, THW)
        slabs = [x_ref[0, 0, kj, :, :] for kj in range(K)]            # (C, THpW) bf16
        # tap (ki, kj): the kj shift was done in the wrapper; the ki shift is a
        # static lane-offset slice (ki*W) of the flattened row window — no
        # (TH, W)->THW flatten in-kernel.
        taps = [slabs[kj][:, ki * W: ki * W + THW]
                for ki in range(K) for kj in range(K)]                # KK x (C, THW)
        pf = jnp.concatenate(taps, axis=0)                            # (KK*C, THW) bf16

        # grouped KxK conv + BN shift on the MXU (bf16 operands, f32 accumulate)
        z = jnp.dot(w_ref[...], pf,
                    preferred_element_type=jnp.float32) + b_ref[...]  # (GKK, THW)

        # unnormalized softmax over the G*K*K axis (normalization deferred)
        z = z - jnp.max(z, axis=0, keepdims=True)
        e = jnp.exp(z)                                                # f32
        denom = jnp.sum(e, axis=0, keepdims=True)                     # (1, THW)

        # broadcast group softmax rows to channel rows:
        #   eb[k*C + g*Cg + cg] = e[k*G + g]
        eb = jnp.broadcast_to(e[:, None, :], (GKK, Cg, THW)).reshape(KK * C, THW)
        # adaptive low-pass filter: per-channel sum over the K*K taps, done as
        # sublane-aligned row slices + f32 adds on the VPU (no one-hot matmul).
        # (On v6e/v7x this multiply could run in bf16; kept f32 for v5e/accuracy.)
        weighted = pf * eb                                            # f32 (KK*C, THW)
        acc = weighted[0:C, :]
        for k in range(1, KK):
            acc = acc + weighted[k * C:(k + 1) * C, :]                # (C, THW) f32

        # single deferred, exact softmax normalization on the small output tile
        out = acc * pl.reciprocal(denom, approx=False)
        o_ref[0, :, :] = out.astype(o_ref.dtype)

    est = _tile_bytes_estimate(TH, W, C, G, K, out_itemsize)
    vmem_limit = int(min(0.9 * vmem_cap, max(32 * 1024 * 1024, 2 * est)))

    out = pl.pallas_call(
        kernel,
        out_shape=jax.ShapeDtypeStruct((N, C, H * W), out_dtype),
        grid_spec=pltpu.PrefetchScalarGridSpec(
            num_scalar_prefetch=0,
            grid=(N, nH),
            in_specs=[
                pl.BlockSpec((1, 1, K, C, THpW), lambda n, h: (n, h, 0, 0, 0)),
                # TODO(synk): the constant weight/shift operands could be
                # single-buffered (pipeline_mode=pl.Buffered(1)); negligible here.
                pl.BlockSpec((GKK, KK * C), lambda n, h: (0, 0)),
                pl.BlockSpec((GKK, 1), lambda n, h: (0, 0)),
            ],
            out_specs=pl.BlockSpec((1, C, THW), lambda n, h: (n, 0, h)),
        ),
        compiler_params=pltpu.CompilerParams(
            dimension_semantics=("parallel", "parallel"),
            vmem_limit_bytes=vmem_limit,
        ),
    )(xwin, wbd, bshift)

    return out.reshape(N, C, H, W)


# ----------------------------- reference -----------------------------------
def _unfold_patches(x, K):
    """ReflectionPad2d(K//2) + F.unfold ordering: (N, C, K*K, H*W)."""
    N, C, H, W = x.shape
    p = K // 2
    xpad = jnp.pad(x, ((0, 0), (0, 0), (p, p), (p, p)), mode="reflect")
    taps = [xpad[:, :, ki:ki + H, kj:kj + W] for ki in range(K) for kj in range(K)]
    return jnp.stack(taps, axis=2).reshape(N, C, K * K, H * W)


def anti_alias_filter_reference(x, conv_w, gamma, beta, run_mean, run_var,
                                *, kernel_size=3, groups=8, eps=1e-5):
    """Pure-JAX f32 reference mirroring the PyTorch forward (eval-mode BN)."""
    N, C, H, W = x.shape
    K = kernel_size
    KK = K * K
    G = groups
    Cg = C // G
    p = K // 2
    xpad = jnp.pad(x, ((0, 0), (0, 0), (p, p), (p, p)), mode="reflect")
    sigma = jax.lax.conv_general_dilated(
        xpad, conv_w, window_strides=(1, 1), padding="VALID",
        feature_group_count=G, dimension_numbers=("NCHW", "OIHW", "NCHW"))
    sigma = ((sigma - run_mean[None, :, None, None])
             / jnp.sqrt(run_var[None, :, None, None] + eps)
             * gamma[None, :, None, None] + beta[None, :, None, None])
    sigma = jax.nn.softmax(sigma, axis=1)                       # (N, G*KK, H, W)
    patches = _unfold_patches(x, K).reshape(N, C, KK, H, W)     # (N, C, KK, H, W)
    p5 = patches.reshape(N, G, Cg, KK, H, W)
    s5 = sigma.reshape(N, G, KK, H, W)
    out = (p5 * s5[:, :, None]).sum(axis=3).reshape(N, C, H, W)
    return out


if __name__ == "__main__":
    # small shapes consistent with the module: batch=2, channels=16 (groups=8
    # requires C % 8 == 0), spatial=16
    N, C, H, W = 2, 16, 16, 16
    K, G = 3, 8
    KK, Cg, GKK = K * K, C // G, G * K * K

    key = jax.random.PRNGKey(0)
    kx, kw, kg, kb, km, kv = jax.random.split(key, 6)

    x = jax.random.normal(kx, (N, C, H, W), dtype=jnp.float32)

    # Conv2d(C, G*K*K, K, groups=G, bias=False) weight, kaiming-ish scale
    conv_w = jax.random.normal(kw, (GKK, Cg, K, K), dtype=jnp.float32) * jnp.sqrt(
        2.0 / (GKK * K * K))

    # BatchNorm2d(G*K*K) parameters / running stats (deterministic, non-trivial)
    gamma = 1.0 + 0.1 * jax.random.normal(kg, (GKK,), dtype=jnp.float32)
    beta = 0.05 * jax.random.normal(kb, (GKK,), dtype=jnp.float32)
    run_mean = 0.1 * jax.random.normal(km, (GKK,), dtype=jnp.float32)
    run_var = jax.random.uniform(kv, (GKK,), minval=0.5, maxval=1.5, dtype=jnp.float32)

    out = anti_alias_filter_pallas(x, conv_w, gamma, beta, run_mean, run_var,
                                   kernel_size=K, groups=G)
    out = jax.block_until_ready(out)

    ref = anti_alias_filter_reference(x, conv_w, gamma, beta, run_mean, run_var,
                                      kernel_size=K, groups=G)
    ref = jax.block_until_ready(ref)

    assert out.shape == (N, C, H, W)
    # bf16 input / bf16 MXU operands (f32 accumulation, f32 softmax & tap sum,
    # exact final normalization) -> compare at bf16-level tolerance against the
    # f32 reference.
    max_err = float(jnp.max(jnp.abs(out - ref)))
    assert jnp.allclose(out, ref, rtol=1e-2, atol=1e-2), max_err
    print("KERNEL_OK")
</pallas_src>

<mosaic_0001>
module attributes {stable_mosaic.version = 11 : i64} {
  func.func @kernel(%arg0: i32, %arg1: i32, %arg2: memref<1x1x3x16x288xbf16, #tpu.memory_space<vmem>>, %arg3: memref<72x144xbf16, #tpu.memory_space<vmem>>, %arg4: memref<72x1xf32, #tpu.memory_space<vmem>>, %arg5: memref<1x16x256xf32, #tpu.memory_space<vmem>>) attributes {dimension_semantics = [#tpu.dimension_semantics<parallel>, #tpu.dimension_semantics<parallel>], iteration_bounds = array<i64: 2, 1>, scalar_prefetch = 0 : i64, scratch_operands = 0 : i64, tpu.core_type = #tpu.core_type<tc>, window_params = [{transform_indices = @transform_0, window_bounds = array<i64: 1, 1, 3, 16, 288>}, {pipeline_mode = #tpu.pipeline_mode<synchronous>, transform_indices = @transform_1, window_bounds = array<i64: 72, 144>}, {pipeline_mode = #tpu.pipeline_mode<synchronous>, transform_indices = @transform_2, window_bounds = array<i64: 72, 1>}, {transform_indices = @transform_3, window_bounds = array<i64: 1, 16, 256>}]} {
    %c0 = arith.constant 0 : index
    %c0_0 = arith.constant 0 : index
    %c0_1 = arith.constant 0 : index
    %c0_2 = arith.constant 0 : index
    %c0_3 = arith.constant 0 : index
    %0 = vector.load %arg2[%c0, %c0_0, %c0_1, %c0_2, %c0_3] : memref<1x1x3x16x288xbf16, #tpu.memory_space<vmem>>, vector<1x1x1x16x288xbf16>
    %1 = vector.shape_cast %0 : vector<1x1x1x16x288xbf16> to vector<16x288xbf16>
    %c0_4 = arith.constant 0 : index
    %c0_5 = arith.constant 0 : index
    %c1 = arith.constant 1 : index
    %c0_6 = arith.constant 0 : index
    %c0_7 = arith.constant 0 : index
    %2 = vector.load %arg2[%c0_4, %c0_5, %c1, %c0_6, %c0_7] : memref<1x1x3x16x288xbf16, #tpu.memory_space<vmem>>, vector<1x1x1x16x288xbf16>
    %3 = vector.shape_cast %2 : vector<1x1x1x16x288xbf16> to vector<16x288xbf16>
    %c0_8 = arith.constant 0 : index
    %c0_9 = arith.constant 0 : index
    %c2 = arith.constant 2 : index
    %c0_10 = arith.constant 0 : index
    %c0_11 = arith.constant 0 : index
    %4 = vector.load %arg2[%c0_8, %c0_9, %c2, %c0_10, %c0_11] : memref<1x1x3x16x288xbf16, #tpu.memory_space<vmem>>, vector<1x1x1x16x288xbf16>
    %5 = vector.shape_cast %4 : vector<1x1x1x16x288xbf16> to vector<16x288xbf16>
    %6 = vector.extract_strided_slice %1 {offsets = [0, 0], sizes = [16, 256], strides = [1, 1]} : vector<16x288xbf16> to vector<16x256xbf16>
    %7 = vector.extract_strided_slice %3 {offsets = [0, 0], sizes = [16, 256], strides = [1, 1]} : vector<16x288xbf16> to vector<16x256xbf16>
    %8 = vector.extract_strided_slice %5 {offsets = [0, 0], sizes = [16, 256], strides = [1, 1]} : vector<16x288xbf16> to vector<16x256xbf16>
    %9 = vector.extract_strided_slice %1 {offsets = [0, 16], sizes = [16, 256], strides = [1, 1]} : vector<16x288xbf16> to vector<16x256xbf16>
    %10 = vector.extract_strided_slice %3 {offsets = [0, 16], sizes = [16, 256], strides = [1, 1]} : vector<16x288xbf16> to vector<16x256xbf16>
    %11 = vector.extract_strided_slice %5 {offsets = [0, 16], sizes = [16, 256], strides = [1, 1]} : vector<16x288xbf16> to vector<16x256xbf16>
    %12 = vector.extract_strided_slice %1 {offsets = [0, 32], sizes = [16, 256], strides = [1, 1]} : vector<16x288xbf16> to vector<16x256xbf16>
    %13 = vector.extract_strided_slice %3 {offsets = [0, 32], sizes = [16, 256], strides = [1, 1]} : vector<16x288xbf16> to vector<16x256xbf16>
    %14 = vector.extract_strided_slice %5 {offsets = [0, 32], sizes = [16, 256], strides = [1, 1]} : vector<16x288xbf16> to vector<16x256xbf16>
    %15 = tpu.concatenate %6, %7, %8, %9, %10, %11, %12, %13, %14 in 0 : vector<16x256xbf16>, vector<16x256xbf16>, vector<16x256xbf16>, vector<16x256xbf16>, vector<16x256xbf16>, vector<16x256xbf16>, vector<16x256xbf16>, vector<16x256xbf16>, vector<16x256xbf16> -> vector<144x256xbf16>
    %c0_12 = arith.constant 0 : index
    %c0_13 = arith.constant 0 : index
    %16 = vector.load %arg3[%c0_12, %c0_13] : memref<72x144xbf16, #tpu.memory_space<vmem>>, vector<72x144xbf16>
    %cst = arith.constant dense<0.000000e+00> : vector<72x256xf32>
    %17 = tpu.matmul %16, %15, %cst {dimension_numbers = #tpu.dot_dimension_numbers<[1], [0], [0], [1], [0, 0, 1, 1], [], []>} : vector<72x144xbf16>, vector<144x256xbf16>, vector<72x256xf32> -> vector<72x256xf32>
    %c0_14 = arith.constant 0 : index
    %c0_15 = arith.constant 0 : index
    %18 = vector.load %arg4[%c0_14, %c0_15] : memref<72x1xf32, #tpu.memory_space<vmem>>, vector<72x1xf32>
    %19 = vector.broadcast %18 : vector<72x1xf32> to vector<72x256xf32>
    %20 = arith.addf %17, %19 : vector<72x256xf32>
    %cst_16 = arith.constant dense<0xFF800000> : vector<256xf32>
    %21 = vector.multi_reduction <maximumf>, %20, %cst_16 [0] : vector<72x256xf32> to vector<256xf32>
    %22 = vector.shape_cast %21 : vector<256xf32> to vector<1x256xf32>
    %23 = vector.broadcast %22 : vector<1x256xf32> to vector<72x256xf32>
    %24 = arith.subf %20, %23 : vector<72x256xf32>
    %25 = math.exp %24 : vector<72x256xf32>
    %cst_17 = arith.constant dense<0.000000e+00> : vector<256xf32>
    %26 = vector.multi_reduction <add>, %25, %cst_17 [0] : vector<72x256xf32> to vector<256xf32>
    %27 = vector.shape_cast %26 : vector<256xf32> to vector<1x256xf32>
    %28 = vector.shape_cast %25 : vector<72x256xf32> to vector<72x1x256xf32>
    %29 = vector.shape_cast %28 : vector<72x1x256xf32> to vector<72x1x256xf32>
    %30 = vector.broadcast %29 : vector<72x1x256xf32> to vector<72x2x256xf32>
    %31 = vector.shape_cast %30 : vector<72x2x256xf32> to vector<144x256xf32>
    %32 = arith.extf %15 : vector<144x256xbf16> to vector<144x256xf32>
    %33 = arith.mulf %32, %31 : vector<144x256xf32>
    %34 = vector.extract_strided_slice %33 {offsets = [0, 0], sizes = [16, 256], strides = [1, 1]} : vector<144x256xf32> to vector<16x256xf32>
    %35 = vector.extract_strided_slice %33 {offsets = [16, 0], sizes = [16, 256], strides = [1, 1]} : vector<144x256xf32> to vector<16x256xf32>
    %36 = arith.addf %34, %35 : vector<16x256xf32>
    %37 = vector.extract_strided_slice %33 {offsets = [32, 0], sizes = [16, 256], strides = [1, 1]} : vector<144x256xf32> to vector<16x256xf32>
    %38 = arith.addf %36, %37 : vector<16x256xf32>
    %39 = vector.extract_strided_slice %33 {offsets = [48, 0], sizes = [16, 256], strides = [1, 1]} : vector<144x256xf32> to vector<16x256xf32>
    %40 = arith.addf %38, %39 : vector<16x256xf32>
    %41 = vector.extract_strided_slice %33 {offsets = [64, 0], sizes = [16, 256], strides = [1, 1]} : vector<144x256xf32> to vector<16x256xf32>
    %42 = arith.addf %40, %41 : vector<16x256xf32>
    %43 = vector.extract_strided_slice %33 {offsets = [80, 0], sizes = [16, 256], strides = [1, 1]} : vector<144x256xf32> to vector<16x256xf32>
    %44 = arith.addf %42, %43 : vector<16x256xf32>
    %45 = vector.extract_strided_slice %33 {offsets = [96, 0], sizes = [16, 256], strides = [1, 1]} : vector<144x256xf32> to vector<16x256xf32>
    %46 = arith.addf %44, %45 : vector<16x256xf32>
    %47 = vector.extract_strided_slice %33 {offsets = [112, 0], sizes = [16, 256], strides = [1, 1]} : vector<144x256xf32> to vector<16x256xf32>
    %48 = arith.addf %46, %47 : vector<16x256xf32>
    %49 = vector.extract_strided_slice %33 {offsets = [128, 0], sizes = [16, 256], strides = [1, 1]} : vector<144x256xf32> to vector<16x256xf32>
    %50 = arith.addf %48, %49 : vector<16x256xf32>
    %51 = tpu.reciprocal %27 : vector<1x256xf32> -> vector<1x256xf32>
    %52 = vector.broadcast %51 : vector<1x256xf32> to vector<16x256xf32>
    %53 = arith.mulf %50, %52 : vector<16x256xf32>
    %c0_18 = arith.constant 0 : index
    %c0_19 = arith.constant 0 : index
    %c0_20 = arith.constant 0 : index
    %54 = vector.load %arg5[%c0_18, %c0_19, %c0_20] : memref<1x16x256xf32, #tpu.memory_space<vmem>>, vector<1x16x256xf32>
    %55 = vector.shape_cast %54 : vector<1x16x256xf32> to vector<16x256xf32>
    %56 = vector.shape_cast %53 : vector<16x256xf32> to vector<1x16x256xf32>
    tpu.vector_store %arg5[%c0_18, %c0_19, %c0_20], %56 {strides = array<i32>} : memref<1x16x256xf32, #tpu.memory_space<vmem>>, vector<1x16x256xf32>,
    return
  }
  func.func @transform_0(%arg0: i32, %arg1: i32) -> (i32, i32, i32, i32, i32) {
    %c0_i32 = arith.constant 0 : i32
    %c0_i32_0 = arith.constant 0 : i32
    %c0_i32_1 = arith.constant 0 : i32
    %c0_i32_2 = arith.constant 0 : i32
    return %arg0, %arg1, %c0_i32, %c0_i32_0, %c0_i32_1 : i32, i32, i32, i32, i32
  }
  func.func @transform_1(%arg0: i32, %arg1: i32) -> (i32, i32) {
    %c0_i32 = arith.constant 0 : i32
    %c0_i32_0 = arith.constant 0 : i32
    %c0_i32_1 = arith.constant 0 : i32
    return %c0_i32, %c0_i32_0 : i32, i32
  }
  func.func @transform_2(%arg0: i32, %arg1: i32) -> (i32, i32) {
    %c0_i32 = arith.constant 0 : i32
    %c0_i32_0 = arith.constant 0 : i32
    %c0_i32_1 = arith.constant 0 : i32
    return %c0_i32, %c0_i32_0 : i32, i32
  }
  func.func @transform_3(%arg0: i32, %arg1: i32) -> (i32, i32, i32) {
    %c0_i32 = arith.constant 0 : i32
    %c0_i32_0 = arith.constant 0 : i32
    return %arg0, %c0_i32, %arg1 : i32, i32, i32
  }
}

</mosaic_0001>

<bundles_post_ra>
// kernel: tpu_custom_call.1
= control target key start
LH: loop header
LB: loop body
LE: loop exit
PB: predicated region body
PF: predicated region fallthrough
CT: control target
= control target key end

     0   :  { %8 = vsyncpa [#allocation3], 0  ;;  %s5380_s0 = inlined_call_operand.hbm [shape: bf16[2,1,3,16,288], index: 0, kind: input, shape index: {}]   ;;  %s5381_s1 = inlined_call_operand.vmem [shape: bf16[72,144], index: 1, kind: input, shape index: {}]   ;;  %s5382_s2 = inlined_call_operand.vmem [shape: f32[72,1], index: 2, kind: input, shape index: {}]   ;;  %s5383_s3 = inlined_call_operand.hbm [shape: f32[2,16,256], index: 3, kind: output, shape index: {}]  }
   0x1   :  { %10 = vsyncpa [#allocation3 + $0x1], 0 }
   0x2   :  { %11 = vsyncpa [#allocation4], 0 }
   0x3   :  { %13 = vsyncpa [#allocation4 + $0x1], 0  ;;  %s3185_s12 = smov 0   ;;  %s3187_s13 = smov 0  }
   0x4   :  { %s3189_s14 = smov 0   ;;  %s3191_s15 = smov 0  }
   0x5   :  { %s3193_s16 = smov 0   ;;  %s3195_s17 = smov 0  }
   0x6 LB: > { %s2839_s18 = sadd.s32 4294967295, %s3152_s17   ;;  %s2840_s19 = sadd.s32 4294967294, %s3152_s17   ;;  %s3152_s17 = sphi %s3195_s17, %s19_s17   ;;  %s3148_s16 = sphi %s3193_s16, %s5881_s16   ;;  %s3144_s15 = sphi %s3191_s15, %s5880_s15   ;;  %s3140_s14 = sphi %s3189_s14, %s5879_s14   ;;  %s3136_s13 = sphi %s3187_s13, %s5878_s13   ;;  %s3132_s12 = sphi %s3185_s12, %s5877_s12  }
   0x7   : > { %s31_s20 = sadd.s32 1, %s3148_s16  ;;  %s40_s21 = sadd.s32 1, %s3140_s14 }
   0x8   : > { %p33_p0 = scmp.ge.s32.totalorder %s31_s20, 2  ;;  %p47_p1 = scmp.ne.s32.totalorder %s3140_s14, %s3136_s13 }
   0x9   : > { %p48_p2 = scmp.eq.s32.totalorder %s3152_s17, 0  ;;  %p53_p3 = scmp.ne.s32.totalorder %s3136_s13, %s3132_s12 }
   0xa   : > { %s5883_s20 = smov (%p33_p0, %s31_s20), 0  ;;  %p54_p5 = scmp.eq.s32.totalorder %s2839_s18, 0 }
   0xb   : > { %p3226_p4 = por %p48_p2, %p47_p1  ;;  %s35_s23 = ssub.s32 %s3148_s16, %s5883_s20 }
   0xc   : > { %p121_p6 = scmp.eq.s32.totalorder %s2839_s18, 1  ;;  %p38_p7 = scmp.eq.s32.totalorder %s35_s23, 0 }
   0xd   : > { %p3232_p8 = por %p54_p5, %p53_p3  ;;  %p127_p10 = scmp.eq.s32.totalorder %s2840_s19, 1 }
   0xe   : > { %p3236_p9 = por %p121_p6, %p47_p1  ;;  %p2917_p13 = scmp.lt.s32.totalorder %s3152_s17, 2 }
   0xf   : > { %s3241_s26 = scalar_select %p38_p7, %s3140_s14, %s40_s21  }
  0x10   : > { %p3243_p11 = por %p127_p10, %p53_p3  ;;  %s153_s28 = sand.u32 1, %s3140_s14  }
  0x11   : > { %s2902_s29 = smul.u32 72, %s153_s28  ;;  %p3253_p0 = pnand %p2917_p13, %p3226_p4 }
  0x12   : > { %s2903_s30 = smul.u32 1152, %s3148_s16  ;;  %p2844_p1 = scmp.ge.s32.totalorder %s3152_s17, 1 }
  0x13   : > { %s157_s8 = scalar_lea.vmem [#allocation2], %s2902_s29  ;;  %s154_s10 = scalar_lea.sflag [#allocation3], %s153_s28 }
  0x14   : > { %s165_s7 = scalar_lea.hbm %s5380_s0, %s2903_s30  ;;  %s166_s9 = sshll.u32 %s157_s8, 4  ;;  %s167_s9 = int_to_ptr.vmem [resolvable:$true] %s166_s9 }
  0x15   : > { %p3046_p2 = pneg %p3253_p0  ;;  %s3057_s11 = scalar_lea.vmem %s167_s9, 1152 }
  0x16   : > { %p3058_p3 = scmp.ne.s32.totalorder %s167_s9, %s3057_s11  ;;  %s3154_s18 = smov [#allocation2]  }
  0x17   : > { %s3062_s19 = sshll.u32 %s3154_s18, 4  ;;  %s3063_s19 = int_to_ptr.vmem [resolvable:$false] %s3062_s19 }
  0x18   : > { %p3060_p5 = pnand %p3058_p3, %p3046_p2  ;;  %s3064_s21 = scalar_lea.vmem %s3063_s19, 2304 }
  0x19   : > { %p3065_p4 = scmp.lt.s32.totalorder %s167_s9, %s3063_s19  ;;  %p3066_p7 = scmp.lt.s32.totalorder %s3064_s21, %s3057_s11 }
  0x1a   : > { %p3061_p6 = pneg %p3060_p5 }
  0x1b   : > { %p3067_p10 = por %p3066_p7, %p3065_p4 }
  0x1d   : > { %p3068_p13 = pnand %p3067_p10, %p3061_p6 }
  0x1f   : > { %3071 = shalt.err (!%p3068_p13)
}
  0x20   : > { %s3155_s22 = smov 192   ;;  %s3156_s23 = smov 12  }
  0x21   : > { %2912 = dma.hbm_to_vmem [thread:$0]  (!%p3253_p0), %s165_s7, 1152, %s167_s9, %s154_s10, %s3155_s22, %s3155_s22, %s3156_s23  }
  0x22   : > { %p174_p12 = scmp.lt.s32.totalorder %s3152_s17, 3 }
  0x24   : > { %p175_p2 = pnand %p2844_p1, %p174_p12 }
  0x26   : > { %178 = sbr.rel (%p175_p2) target bundleno = 669 (0x29d), region = 32 }
  0x2b   : > { %s3269_s28 = sand.u32 1, %s3136_s13  }
  0x2c   : > { %s2904_s29 = smul.u32 72, %s3269_s28  ;;  %s181_s30 = scalar_lea.sflag [#allocation3], %s3269_s28 }
  0x2e   : > { %s184_s5 = scalar_lea.vmem [#allocation2], %s2904_s29 }
  0x2f   : > { %3123 = dma.done.wait (%p3232_p8), %s181_s30, 1152  }
  0x30   : > { %3125 = vsyncadd (%p3232_p8), %s181_s30, 4294966144  ;;  %v3277_v0 = vld [vmem:[%s184_s5 + $0x1c] ss:$12 sps:$4 sm:$0xff]   ;;  %v3279_v1 = vld [vmem:[%s184_s5 + $0x18] ss:$12 sps:$4 sm:$0xff]   ;;  %s3157_s4 = smov 96  }
  0x31   : > { %5491 = vst [vmem:[#allocation8_spill] sm:$0xff] %v3277_v0  ;;  %5492 = vst [vmem:[#allocation9_spill] sm:$0xff] %v3279_v1  ;;  %312 = vrot.lane.b32.xlu0 %v3277_v0, %s3157_s4  ;;  %v2981_v2 = vld [vmem:[%s184_s5 + $0x20] ss:$12 sps:$4 sm:$0xff]   ;;  %310 = vrot.lane.b32.xlu1 %v3279_v1, %s3157_s4  ;;  %v3283_v3 = vld [vmem:[%s184_s5 + $0x4] ss:$12 sps:$4 sm:$0xff]  }
  0x32   : > { %5493 = vst [vmem:[#allocation10_spill] sm:$0xff] %v3283_v3  ;;  %v2984_v4 = vld [vmem:[%s184_s5 + $0x8] ss:$12 sps:$4 sm:$0xff]   ;;  %v3285_v5 = vld [vmem:[%s184_s5] ss:$12 sps:$4 sm:$0xff]   ;;  %s3158_s24 = smov 112  }
  0x33   : > { %5494 = vst [vmem:[#allocation11_spill] sm:$0xff] %v3285_v5  ;;  %v3288_v6 = vld [vmem:[%s184_s5 + $0x34] ss:$12 sps:$4 sm:$0xff]   ;;  %v2988_v7 = vld [vmem:[%s184_s5 + $0x38] ss:$12 sps:$4 sm:$0xff]   ;;  %vm435_vm0 = vcmask 130048  }
  0x34   : > { %5495 = vst [vmem:[#allocation12_spill] sm:$0xff] %v3288_v6  ;;  %v3292_v8 = vld [vmem:[%s184_s5 + $0x30] ss:$12 sps:$4 sm:$0xff]   ;;  %v3159_v13 = vmov 0   ;;  %v340_v14 = vld [vmem:[%s5382_s2 + $0x8] sm:$0xff]  ;;  %vm305_vm1 = vcmask 785408  }
  0x35   : > { %314 = vrot.lane.b32.xlu0 %v2981_v2, %s3157_s4  ;;  %301 = vrot.lane.b32.xlu1 %v3283_v3, %s3157_s4  ;;  %5496 = vst [vmem:[#allocation13_spill] sm:$0xff] %v3292_v8  ;;  %v2992_v9 = vld [vmem:[%s5381_s1 + $0x4] ss:$8 sps:$4 sm:$0xff]   ;;  %v2995_v10 = vld [vmem:[%s5381_s1 + $0x34] ss:$8 sps:$4 sm:$0xff]   ;;  %vm264_vm2 = vcmask 916480  }
  0x36   : > { %2873 = vmatprep.mubr.msk.bf16.mxu0 %vm435_vm0, %v2992_v9  ;;  %2876 = vmatprep.mubr.msk.bf16.mxu1 %vm435_vm0, %v2995_v10  ;;  %v341_v11 = vld [vmem:[%s5382_s2 + $0x10] sm:$0xff]  ;;  %v339_v12 = vld [vmem:[%s5382_s2] sm:$0xff]  ;;  %v342_v15 = vld [vmem:[%s5382_s2 + $0x18] sm:$0xff]  ;;  %s2845_s10 = sshll.u32 %s3269_s28, 5  ;;  %s2883_s11 = sshll.u32 %s3144_s15, 9 }
  0x37   : > { %2977 = vset.pattern.permute.xlu1 %v3159_v13  ;;  %2976 = vset.pattern.permute.xlu0 %v3159_v13  ;;  %v343_v16 = vld [vmem:[%s5382_s2 + $0x20] sm:$0xff]  ;;  %v344_v17 = vld [vmem:[%s5382_s2 + $0x28] sm:$0xff]  ;;  %v345_v18 = vld [vmem:[%s5382_s2 + $0x30] sm:$0xff]  ;;  %s206_s18 = scalar_lea.vmem [#allocation5], %s2845_s10  ;;  %s5330_s23 = scalar_lea.hbm %s5383_s3, %s2883_s11 }
  0x38   : > { %v346_v19 = vld [vmem:[%s5382_s2 + $0x38] sm:$0xff]  ;;  %v347_v20 = vld [vmem:[%s5382_s2 + $0x40] sm:$0xff]  ;;  %s2752_s19 = sshll.u32 %s206_s18, 4  ;;  %s2737_s15 = scalar_lea.sflag [#allocation4], %s3269_s28  ;;  %s5332_s19 = int_to_ptr.vmem [resolvable:$true] %s2752_s19 }
  0x39   : > { %303 = vrot.lane.b32.xlu0 %v2984_v4, %s3157_s4  ;;  %299 = vrot.lane.b32.xlu1 %v3285_v5, %s3157_s4  ;;  %v338_v50 = vld [vmem:[%s5381_s1 + $0x40] sm:$0xff]  ;;  %v2993_v53 = vld [vmem:[%s5381_s1 + $0x30] ss:$8 sps:$4 sm:$0xff]   ;;  %s3072_s29 = scalar_lea.vmem %s5332_s19, 512  ;;  %s3162_s30 = smov [#allocation5]  }
  0x3a   : > { %v2990_v52 = vld [vmem:[%s5381_s1] ss:$8 sps:$4 sm:$0xff]   ;;  %v2996_v54 = vld [vmem:[%s5381_s1 + $0x14] ss:$8 sps:$4 sm:$0xff]   ;;  %v2872_v55 = vcombine.high %v338_v50, %v338_v50  ;;  %v2999_v56 = vld [vmem:[%s5381_s1 + $0x10] ss:$8 sps:$4 sm:$0xff]   ;;  %v2871_v57 = vcombine.low %v338_v50, %v338_v50  ;;  %p3073_p8 = scmp.ne.s32.totalorder %s5332_s19, %s3072_s29 }
  0x3b   : > { %v3001_v58 = vld [vmem:[%s5381_s1 + $0x24] ss:$8 sps:$4 sm:$0xff]   ;;  %v3003_v59 = vld [vmem:[%s5381_s1 + $0x20] ss:$8 sps:$4 sm:$0xff]   ;;  %s3076_s5 = sshll.u32 %s3162_s30, 4  ;;  %s3077_s5 = int_to_ptr.vmem [resolvable:$false] %s3076_s5 }
  0x3c   : > { %p3074_p12 = pnand %p3073_p8, %p3236_p9  ;;  %p3079_p1 = scmp.lt.s32.totalorder %s5332_s19, %s3077_s5 }
  0x3d   : > { %291 = vrot.lane.b32.xlu0 %v3288_v6, %s3158_s24  ;;  %293 = vrot.lane.b32.xlu1 %v2988_v7, %s3158_s24 }
  0x3e   : > { %p3075_p0 = pneg %p3074_p12 }
  0x41   : > { %289 = vrot.lane.b32.xlu0 %v3292_v8, %s3158_s24  ;;  %276 = vrot.lane.b32.xlu1 %v3277_v0, %s3158_s24 }
  0x45   : > { %278 = vrot.lane.b32.xlu0 %v2981_v2, %s3158_s24  ;;  %274 = vrot.lane.b32.xlu1 %v3279_v1, %s3158_s24 }
  0x49   : > { %260 = vrot.lane.b32.xlu0 %v3283_v3, %s3158_s24  ;;  %262 = vrot.lane.b32.xlu1 %v2984_v4, %s3158_s24 }
  0x4d   : > { %258 = vrot.lane.b32.xlu0 %v3285_v5, %s3158_s24  ;;  %322 = vrot.lane.b32.xlu1 %v3288_v6, %s3157_s4 }
  0x51   : > { %324 = vrot.lane.b32.xlu0 %v2988_v7, %s3157_s4  ;;  %320 = vrot.lane.b32.xlu1 %v3292_v8, %s3157_s4  ;;  %s3078_s4 = scalar_lea.vmem %s3077_s5, 1024 }
  0x52   : > { %p3080_p3 = scmp.lt.s32.totalorder %s3078_s4, %s3072_s29 }
  0x54   : > { %p3081_p5 = por %p3080_p3, %p3079_p1 }
  0x55   : > { %360 = vperm.xlu1 %2977, %v341_v11   ;;  %350 = vperm.xlu0 %2976, %v339_v12  }
  0x56   : > { %p3082_p6 = pnand %p3081_p5, %p3075_p0 }
  0x59   : > { %355 = vperm.xlu1 %2977, %v340_v14   ;;  %365 = vperm.xlu0 %2976, %v342_v15  }
  0x5d   : > { %370 = vperm.xlu1 %2977, %v343_v16   ;;  %375 = vperm.xlu0 %2976, %v344_v17  }
  0x61   : > { %380 = vperm.xlu1 %2977, %v345_v18   ;;  %385 = vperm.xlu0 %2976, %v346_v19  }
  0x65   : > { %390 = vperm.xlu1 %2977, %v347_v20  }
  0xa3   : > { %v313_v21 = vpop.permute.xlu0 %312  ;;  %v311_v22 = vpop.permute.xlu1 %310 }
  0xa4   : > { %v3340_v26 = vsel %vm305_vm1, %v311_v22, %v313_v21 }
  0xa5   : > { %5498 = vst [vmem:[#allocation15_spill] sm:$0xff] %v3340_v26 }
  0xa7   : > { %v315_v23 = vpop.permute.xlu0 %314  ;;  %v302_v25 = vpop.permute.xlu1 %301 }
  0xa8   : > { %v3337_v24 = vsel %vm305_vm1, %v313_v21, %v315_v23 }
  0xa9   : > { %5497 = vst [vmem:[#allocation14_spill] sm:$0xff] %v3337_v24  ;;  %451 = vmatprep.subr.bf16.mxu0 %v3337_v24  ;;  %2884 = vmatprep.subr.bf16.mxu1 %v3337_v24 }
  0xaa   : > { %452 = vmatpush1.bf16.msra.mxu0 %v3340_v26  ;;  %2893 = vmatpush1.bf16.msra.mxu1 %v3340_v26 }
  0xab   : > { %v304_v27 = vpop.permute.xlu0 %303  ;;  %v300_v29 = vpop.permute.xlu1 %299 }
  0xac   : > { %v3347_v28 = vsel %vm305_vm1, %v302_v25, %v304_v27  ;;  %v3350_v30 = vsel %vm305_vm1, %v300_v29, %v302_v25 }
  0xad   : > { %5499 = vst [vmem:[#allocation16_spill] sm:$0xff] %v3347_v28  ;;  %5500 = vst [vmem:[#allocation17_spill] sm:$0xff] %v3350_v30  ;;  %453 = vmatprep.subr.bf16.mxu0 %v3347_v28  ;;  %2885 = vmatprep.subr.bf16.mxu1 %v3347_v28 }
  0xae   : > { %454 = vmatpush1.bf16.msra.mxu0 %v3350_v30  ;;  %2894 = vmatpush1.bf16.msra.mxu1 %v3350_v30 }
  0xaf   : > { %v292_v31 = vpop.permute.xlu0 %291  ;;  %v294_v32 = vpop.permute.xlu1 %293 }
  0xb0   : > { %v3357_v33 = vsel %vm264_vm2, %v292_v31, %v294_v32 }
  0xb1   : > { %5501 = vst [vmem:[#allocation18_spill] sm:$0xff] %v3357_v33  ;;  %455 = vmatprep.subr.bf16.mxu0 %v3357_v33  ;;  %2886 = vmatprep.subr.bf16.mxu1 %v3357_v33 }
  0xb3   : > { %v290_v34 = vpop.permute.xlu0 %289  ;;  %v277_v36 = vpop.permute.xlu1 %276 }
  0xb4   : > { %v3362_v35 = vsel %vm264_vm2, %v290_v34, %v292_v31 }
  0xb5   : > { %5502 = vst [vmem:[#allocation19_spill] sm:$0xff] %v3362_v35  ;;  %456 = vmatpush1.bf16.msra.mxu0 %v3362_v35  ;;  %2895 = vmatpush1.bf16.msra.mxu1 %v3362_v35 }
  0xb7   : > { %v279_v37 = vpop.permute.xlu0 %278  ;;  %v275_v39 = vpop.permute.xlu1 %274 }
  0xb8   : > { %v3367_v38 = vsel %vm264_vm2, %v277_v36, %v279_v37  ;;  %v3370_v40 = vsel %vm264_vm2, %v275_v39, %v277_v36 }
  0xb9   : > { %5503 = vst [vmem:[#allocation20_spill] sm:$0xff] %v3367_v38  ;;  %5504 = vst [vmem:[#allocation21_spill] sm:$0xff] %v3370_v40  ;;  %457 = vmatprep.subr.bf16.mxu0 %v3367_v38  ;;  %2887 = vmatprep.subr.bf16.mxu1 %v3367_v38 }
  0xba   : > { %458 = vmatpush1.bf16.msra.mxu0 %v3370_v40  ;;  %2896 = vmatpush1.bf16.msra.mxu1 %v3370_v40 }
  0xbb   : > { %v261_v41 = vpop.permute.xlu0 %260  ;;  %v263_v42 = vpop.permute.xlu1 %262 }
  0xbc   : > { %v3377_v43 = vsel %vm264_vm2, %v261_v41, %v263_v42 }
  0xbd   : > { %5505 = vst [vmem:[#allocation22_spill] sm:$0xff] %v3377_v43  ;;  %459 = vmatprep.subr.bf16.mxu0 %v3377_v43  ;;  %2888 = vmatprep.subr.bf16.mxu1 %v3377_v43 }
  0xbf   : > { %v259_v44 = vpop.permute.xlu0 %258  ;;  %v323_v46 = vpop.permute.xlu1 %322 }
  0xc0   : > { %v3382_v45 = vsel %vm264_vm2, %v259_v44, %v261_v41 }
  0xc1   : > { %5506 = vst [vmem:[#allocation23_spill] sm:$0xff] %v3382_v45  ;;  %460 = vmatpush1.bf16.msra.mxu0 %v3382_v45  ;;  %2897 = vmatpush1.bf16.msra.mxu1 %v3382_v45 }
  0xc2   : > { %461 = vmatprep.subr.bf16.mxu0 %v3288_v6  ;;  %2889 = vmatprep.subr.bf16.mxu1 %v3288_v6 }
  0xc3   : > { %v325_v47 = vpop.permute.xlu0 %324  ;;  %v321_v49 = vpop.permute.xlu1 %320 }
  0xc4   : > { %v3397_v48 = vsel %vm305_vm1, %v323_v46, %v325_v47  ;;  %v3407_v51 = vsel %vm305_vm1, %v321_v49, %v323_v46 }
  0xc5   : > { %462 = vmatpush1.bf16.msra.mxu0 %v3292_v8  ;;  %2898 = vmatpush1.bf16.msra.mxu1 %v3292_v8  ;;  %5507 = vst [vmem:[#allocation24_spill] sm:$0xff] %v3397_v48  ;;  %5508 = vst [vmem:[#allocation25_spill] sm:$0xff] %v3407_v51 }
  0xc6   : > { %463 = vmatprep.subr.bf16.mxu0 %v3277_v0  ;;  %2890 = vmatprep.subr.bf16.mxu1 %v3277_v0 }
  0xc9   : > { %464 = vmatpush1.bf16.msra.mxu0 %v3279_v1  ;;  %2899 = vmatpush1.bf16.msra.mxu1 %v3279_v1 }
  0xca   : > { %465 = vmatprep.subr.bf16.mxu0 %v3283_v3  ;;  %2891 = vmatprep.subr.bf16.mxu1 %v3283_v3 }
  0xcd   : > { %466 = vmatpush1.bf16.msra.mxu0 %v3285_v5  ;;  %2900 = vmatpush1.bf16.msra.mxu1 %v3285_v5 }
  0xce   : > { %481 = vmatprep.subr.bf16.mxu0 %v3397_v48  ;;  %2892 = vmatprep.subr.bf16.mxu1 %v3397_v48 }
  0xd0   : > { %v361_v60 = vpop.permute.xlu1 %360  ;;  %v351_v2 = vpop.permute.xlu0 %350 }
  0xd1   : > { %482 = vmatpush2.bf16.msra.mxu0 %v3407_v51  ;;  %2901 = vmatpush2.bf16.msra.mxu1 %v3407_v51 }
  0xd4   : > { %484 = vmatmul.mubr.bf16.vlgmr.msra.gmra.mxu0 %v2990_v52  ;;  %514 = vmatmul.mubr.bf16.vlgmr.msra.gmra.mxu1 %v2993_v53  ;;  %v356_v61 = vpop.permute.xlu1 %355  ;;  %v366_v14 = vpop.permute.xlu0 %365 }
  0xd5   : > { %2874 = vmatprep.mubr.msk.bf16.mxu0 %vm435_vm0, %v2996_v54  ;;  %2877 = vmatprep.mubr.msk.bf16.mxu1 %vm435_vm0, %v2872_v55 }
  0xd8   : > { %v371_v11 = vpop.permute.xlu1 %370  ;;  %v376_v22 = vpop.permute.xlu0 %375 }
  0xdc   : > { %494 = vmatmul.mubr.bf16.gmra.mxu0 %v2999_v56  ;;  %524 = vmatmul.mubr.bf16.gmra.mxu1 %v2871_v57  ;;  %v381_v19 = vpop.permute.xlu1 %380  ;;  %v386_v50 = vpop.permute.xlu0 %385 }
  0xdd   : > { %2875 = vmatprep.mubr.msk.bf16.mxu0 %vm435_vm0, %v3001_v58 }
  0xe0   : > { %v391_v37 = vpop.permute.xlu1 %390 }
  0xe4   : > { %504 = vmatmul.mubr.bf16.gmra.mxu0 %v3003_v59 }
 0x194   : > { %v485_v62 = vpop.f32.mrf.mxu0  ;;  %v515_v63 = vpop.f32.mrf.mxu1 }
 0x195   : > { %v486_v29 = vadd.f32 %v485_v62, %v351_v2  ;;  %v3443_v42 = vadd.f32 %v515_v63, %v381_v19 }
 0x196   : > { %v487_v4 = vpop.f32.mrf.mxu0  ;;  %v517_v7 = vpop.f32.mrf.mxu1 }
 0x197   : > { %v3436_v34 = vadd.f32 %v487_v4, %v351_v2  ;;  %v3452_v54 = vadd.f32 %v517_v7, %v381_v19 }
 0x198   : > { %v489_v9 = vpop.f32.mrf.mxu0  ;;  %v519_v10 = vpop.f32.mrf.mxu1 }
 0x199   : > { %v490_v47 = vadd.f32 %v489_v9, %v356_v61  ;;  %v3463_v2 = vadd.f32 %v519_v10, %v386_v50 }
 0x19a   : > { %v491_v12 = vpop.f32.mrf.mxu0  ;;  %v521_v13 = vpop.f32.mrf.mxu1 }
 0x19b   : > { %v3454_v55 = vadd.f32 %v491_v12, %v356_v61 }
 0x19c   : > { %v495_v15 = vpop.f32.mrf.mxu0  ;;  %v525_v16 = vpop.f32.mrf.mxu1 }
 0x19d   : > { %v3432_v23 = vadd.f32 %v495_v15, %v361_v60  ;;  %v3456_v56 = vadd.f32 %v525_v16, %v391_v37 }
 0x19e   : > { %v497_v17 = vpop.f32.mrf.mxu0  ;;  %v527_v18 = vpop.f32.mrf.mxu1 }
 0x19f   : > { %v3434_v31 = vadd.f32 %v497_v17, %v361_v60  ;;  %v532_v36 = vmax.f32 %v486_v29, %v3432_v23  ;;  %v3461_v63 = vadd.f32 %v527_v18, %v391_v37 }
 0x1a0   : > { %v499_v20 = vpop.f32.mrf.mxu0  ;;  %v529_v21 = vpop.f32.mrf.mxu1 }
 0x1a1   : > { %v3439_v39 = vadd.f32 %v499_v20, %v366_v14  ;;  %v546_v49 = vmax.f32 %v3436_v34, %v3434_v31 }
 0x1a2   : > { %v501_v25 = vpop.f32.mrf.mxu0  ;;  %v530_v27 = vpop.f32.mrf.mxu1 }
 0x1a3   : > { %v3445_v44 = vadd.f32 %v501_v25, %v366_v14  ;;  %v533_v58 = vmax.f32 %v490_v47, %v3439_v39  ;;  %v3471_v14 = vadd.f32 %v521_v13, %v386_v50 }
 0x1a4   : > { %v505_v32 = vpop.f32.mrf.mxu0 }
 0x1a5   : > { %v3441_v41 = vadd.f32 %v505_v32, %v371_v11  ;;  %v547_v4 = vmax.f32 %v3454_v55, %v3445_v44 }
 0x1a6   : > { %v507_v46 = vpop.f32.mrf.mxu0 }
 0x1a7   : > { %v534_v52 = vmax.f32 %v532_v36, %v3441_v41  ;;  %v3450_v53 = vadd.f32 %v507_v46, %v371_v11 }
 0x1a8   : > { %v509_v57 = vpop.f32.mrf.mxu0 }
 0x1a9   : > { %v536_v59 = vmax.f32 %v534_v52, %v3443_v42  ;;  %v548_v60 = vmax.f32 %v546_v49, %v3450_v53  ;;  %v510_v62 = vadd.f32 %v509_v57, %v376_v22 }
 0x1aa   : > { %v511_v7 = vpop.f32.mrf.mxu0 }
 0x1ab   : > { %v538_v61 = vmax.f32 %v536_v59, %v3456_v56  ;;  %v550_v9 = vmax.f32 %v548_v60, %v3452_v54  ;;  %v535_v11 = vmax.f32 %v533_v58, %v510_v62  ;;  %v3469_v12 = vadd.f32 %v511_v7, %v376_v22 }
 0x1ad   : > { %v552_v15 = vmax.f32 %v550_v9, %v3461_v63  ;;  %v537_v16 = vmax.f32 %v535_v11, %v3463_v2  ;;  %v549_v10 = vmax.f32 %v547_v4, %v3469_v12 }
 0x1af   : > { %v539_v17 = vmax.f32 %v538_v61, %v537_v16  ;;  %v551_v18 = vmax.f32 %v549_v10, %v3471_v14 }
 0x1b1   : > { %v540_v19 = vrot.slane %v539_v17, 4  ;;  %v553_v20 = vmax.f32 %v552_v15, %v551_v18 }
 0x1b3   : > { %v541_v21 = vmax.f32 %v539_v17, %v540_v19  ;;  %v554_v25 = vrot.slane %v553_v20, 4 }
 0x1b5   : > { %v542_v27 = vrot.slane %v541_v21, 2  ;;  %v555_v32 = vmax.f32 %v553_v20, %v554_v25 }
 0x1b7   : > { %v543_v36 = vmax.f32 %v541_v21, %v542_v27  ;;  %v556_v22 = vrot.slane %v555_v32, 2 }
 0x1b9   : > { %v544_v37 = vrot.slane %v543_v36, 1  ;;  %v557_v13 = vmax.f32 %v555_v32, %v556_v22 }
 0x1bb   : > { %v545_v46 = vmax.f32 %v543_v36, %v544_v37  ;;  %v558_v49 = vrot.slane %v557_v13, 1 }
 0x1bd   : > { %v560_v50 = vsub.f32 %v486_v29, %v545_v46  ;;  %v562_v52 = vsub.f32 %v490_v47, %v545_v46  ;;  %v564_v57 = vsub.f32 %v3432_v23, %v545_v46  ;;  %v566_v58 = vsub.f32 %v3439_v39, %v545_v46 }
 0x1be   : > { %v568_v59 = vsub.f32 %v3441_v41, %v545_v46  ;;  %v572_v60 = vsub.f32 %v3443_v42, %v545_v46  ;;  %v574_v4 = vsub.f32 %v3463_v2, %v545_v46  ;;  %v570_v7 = vsub.f32 %v510_v62, %v545_v46 }
 0x1bf   : > { %v576_v61 = vsub.f32 %v3456_v56, %v545_v46  ;;  %v578_v9 = vmul.f32 1.442695, %v560_v50  ;;  %v582_v11 = vmul.f32 1.442695, %v562_v52  ;;  %v586_v15 = vmul.f32 1.442695, %v564_v57 }
 0x1c0   : > { %v3483_v16 = vmax.f32 %v557_v13, %v558_v49  ;;  %v590_v42 = vmul.f32 1.442695, %v566_v58  ;;  %v594_v56 = vmul.f32 1.442695, %v568_v59  ;;  %v598_v62 = vmul.f32 1.442695, %v570_v7 }
 0x1c1   : > { %3004 = vpow2.f32 %v578_v9  ;;  %v606_v49 = vmul.f32 1.442695, %v574_v4  ;;  %v610_v7 = vmul.f32 1.442695, %v576_v61 }
 0x1c2   : > { %3006 = vpow2.f32 %v582_v11  ;;  %v561_v47 = vsub.f32 %v3436_v34, %v3483_v16  ;;  %v563_v2 = vsub.f32 %v3454_v55, %v3483_v16  ;;  %v565_v10 = vsub.f32 %v3434_v31, %v3483_v16 }
 0x1c3   : > { %3008 = vpow2.f32 %v586_v15  ;;  %v573_v17 = vsub.f32 %v3452_v54, %v3483_v16  ;;  %v575_v18 = vsub.f32 %v3471_v14, %v3483_v16  ;;  %v577_v19 = vsub.f32 %v3461_v63, %v3483_v16 }
 0x1c4   : > { %v602_v55 = vmul.f32 1.442695, %v572_v60  ;;  %3010 = vpow2.f32 %v590_v42  ;;  %v567_v31 = vsub.f32 %v3445_v44, %v3483_v16  ;;  %v580_v54 = vmul.f32 1.442695, %v561_v47 }
 0x1c5   : > { %3012 = vpow2.f32 %v594_v56  ;;  %v571_v32 = vsub.f32 %v3469_v12, %v3483_v16  ;;  %v584_v36 = vmul.f32 1.442695, %v563_v2  ;;  %v588_v13 = vmul.f32 1.442695, %v565_v10 }
 0x1c6   : > { %3014 = vpow2.f32 %v598_v62  ;;  %v569_v44 = vsub.f32 %v3450_v53, %v3483_v16  ;;  %v592_v12 = vmul.f32 1.442695, %v567_v31  ;;  %v3160_v15 = vmov 1966171168  }
 0x1c7   : > { %3016 = vpow2.f32 %v602_v55  ;;  %v600_v58 = vmul.f32 1.442695, %v571_v32  ;;  %v663_v42 = vunpack.c.l.s4 %v3160_v15  ;;  %v665_v47 = vlaneseq }
 0x1c8   : > { %3018 = vpow2.f32 %v580_v54  ;;  %v596_v53 = vmul.f32 1.442695, %v569_v44  ;;  %v3161_v31 = vmov 1983009808   ;;  %v608_v57 = vmul.f32 1.442695, %v575_v18 }
 0x1c9   : > { %3020 = vpow2.f32 %v584_v36  ;;  %v1688_v54 = vunpack.c.l.s4 %v3161_v31  ;;  %v666_v15 = vshrl.u32 %v665_v47, 7  ;;  %v612_v14 = vmul.f32 1.442695, %v577_v19 }
 0x1ca   : > { %3022 = vpow2.f32 %v588_v13 }
 0x1cb   : > { %3024 = vpow2.f32 %v606_v49  ;;  %v604_v49 = vmul.f32 1.442695, %v573_v17  ;;  %v1689_v47 = vunpack.c.0.s8 %v1688_v54  ;;  %v3564_v62 = vsub.s32 0, %v666_v15 }
 0x1cc   : > { %3026 = vpow2.f32 %v592_v12 }
 0x1cd   : > { %3028 = vpow2.f32 %v600_v58  ;;  %v664_v58 = vunpack.c.0.s8 %v663_v42  ;;  %v3570_v2 = vsub.s32 %v1689_v47, %v666_v15 }
 0x1ce   : > { %v3521_v9 = vpop.eup %3004  ;;  %3030 = vpow2.f32 %v610_v7 }
 0x1cf   : > { %v3524_v56 = vpop.eup %3006  ;;  %3032 = vpow2.f32 %v596_v53  ;;  %5509 = vst [vmem:[#allocation26_spill] sm:$0xff] %v3570_v2 }
 0x1d0   : > { %v614_v55 = vadd.f32 %v3524_v56, %v3521_v9  ;;  %v3532_v32 = vpop.eup %3008  ;;  %3034 = vpow2.f32 %v604_v49  ;;  %v3566_v49 = vsub.s32 1, %v666_v15 }
 0x1d1   : > { %v3538_v7 = vpop.eup %3010  ;;  %3036 = vpow2.f32 %v608_v57 }
 0x1d2   : > { %v615_v12 = vadd.f32 %v3532_v32, %v614_v55  ;;  %v3546_v53 = vpop.eup %3012  ;;  %3038 = vpow2.f32 %v612_v14 }
 0x1d3   : > { %v3015_v50 = vpop.eup %3014 }
 0x1d4   : > { %v616_v42 = vadd.f32 %v3538_v7, %v615_v12  ;;  %v3556_v18 = vpop.eup %3016  ;;  %v3561_v12 = vsub.s32 %v664_v58, %v666_v15 }
 0x1d5   : > { %v3019_v54 = vpop.eup %3018 }
 0x1d6   : > { %v617_v61 = vadd.f32 %v3546_v53, %v616_v42  ;;  %v3021_v63 = vpop.eup %3020  ;;  %v660_v19 = vcombine.low %v3521_v9, %v3019_v54  ;;  %v661_v60 = vcombine.high %v3521_v9, %v3019_v54 }
 0x1d7   : > { %v3572_v11 = vpop.eup %3022  ;;  %v628_v58 = vadd.f32 %v3021_v63, %v3019_v54  ;;  %v710_v42 = vcombine.low %v3524_v56, %v3021_v63  ;;  %v711_v57 = vcombine.high %v3524_v56, %v3021_v63 }
 0x1d8   : > { %v618_v16 = vadd.f32 %v3015_v50, %v617_v61  ;;  %v3576_v36 = vpop.eup %3024  ;;  %v668_v61 = vrot.slane %v660_v19, %v3561_v12  ;;  %v675_v44 = vrot.slane %v661_v60, %v3561_v12 }
 0x1d9   : > { %v3583_v15 = vpop.eup %3026  ;;  %v629_v47 = vadd.f32 %v3572_v11, %v628_v58  ;;  %v3587_v14 = vrot.slane %v710_v42, %v3561_v12  ;;  %v3590_v56 = vrot.slane %v711_v57, %v3561_v12 }
 0x1da   : > { %v619_v10 = vadd.f32 %v3556_v18, %v618_v16  ;;  %v3029_v63 = vpop.eup %3028  ;;  %v676_v60 = vcombine.high %v668_v61, %v668_v61  ;;  %v677_v19 = vcombine.high %v675_v44, %v675_v44  ;;  %v3596_v31 = vrot.slane %v668_v61, %v3561_v12 }
 0x1db   : > { %v3598_v13 = vpop.eup %3030  ;;  %v630_v58 = vadd.f32 %v3583_v15, %v629_v47  ;;  %v910_v42 = vcombine.low %v3015_v50, %v3029_v63  ;;  %v911_v59 = vcombine.high %v3015_v50, %v3029_v63  ;;  %v3602_v57 = vrot.slane %v675_v44, %v3561_v12 }
 0x1dc   : > { %v620_v16 = vadd.f32 %v3576_v36, %v619_v10  ;;  %5510 = vst [vmem:[#allocation27_spill] sm:$0xff] %v3596_v31  ;;  %v3604_v17 = vpop.eup %3032  ;;  %v3608_v10 = vrot.slane %v676_v60, %v3561_v12  ;;  %v3611_v52 = vrot.slane %v677_v19, %v3561_v12  ;;  %v3615_v61 = vcombine.high %v3596_v31, %v3596_v31 }
 0x1dd   : > { %5511 = vst [vmem:[#allocation28_spill] sm:$0xff] %v3602_v57  ;;  %v631_v47 = vadd.f32 %v3604_v17, %v630_v58  ;;  %v918_v50 = vrot.slane %v910_v42, %v3561_v12  ;;  %v925_v44 = vrot.slane %v911_v59, %v3561_v12  ;;  %v3622_v55 = vcombine.high %v3602_v57, %v3602_v57  ;;  %v3635_v27 = vpop.eup %3034 }
 0x1de   : > { %v621_v4 = vadd.f32 %v3598_v13, %v620_v16  ;;  %5512 = vst [vmem:[#allocation29_spill] sm:$0xff] %v3608_v10  ;;  %5513 = vst [vmem:[#allocation30_spill] sm:$0xff] %v3611_v52  ;;  %v3626_v60 = vcombine.high %v3608_v10, %v3608_v10  ;;  %v3630_v19 = vcombine.high %v3611_v52, %v3611_v52 }
 0x1df   : > { %v726_v58 = vcombine.high %v3587_v14, %v3587_v14  ;;  %v632_v22 = vadd.f32 %v3029_v63, %v631_v47  ;;  %v926_v42 = vcombine.high %v918_v50, %v918_v50  ;;  %v927_v46 = vcombine.high %v925_v44, %v925_v44 }
 0x1e0   : > { %v622_v16 = vrot.slane %v621_v4, 4  ;;  %5514 = vst [vmem:[#allocation31_spill] sm:$0xff] %v3626_v60  ;;  %v934_v59 = vrot.slane %v918_v50, %v3561_v12  ;;  %v941_v23 = vrot.slane %v925_v44, %v3561_v12  ;;  %v727_v41 = vcombine.high %v3590_v56, %v3590_v56  ;;  %v3647_v50 = vpop.eup %3036 }
 0x1e1   : > { %v3642_v29 = vrot.slane %v3587_v14, %v3561_v12  ;;  %v633_v39 = vadd.f32 %v3635_v27, %v632_v22  ;;  %v948_v63 = vrot.slane %v926_v42, %v3561_v12  ;;  %v955_v47 = vrot.slane %v927_v46, %v3561_v12  ;;  %v3657_v42 = vpop.eup %3038 }
 0x1e2   : > { %v623_v37 = vadd.f32 %v622_v16, %v621_v4  ;;  %v956_v20 = vcombine.high %v934_v59, %v934_v59  ;;  %v957_v4 = vcombine.high %v941_v23, %v941_v23  ;;  %v1433_v44 = vrot.slane %v934_v59, %v3564_v62 }
 0x1e3   : > { %v1437_v16 = vrot.slane %v934_v59, %v3566_v49  ;;  %v634_v34 = vadd.f32 %v3647_v50, %v633_v39  ;;  %v3652_v21 = vcombine.high %v948_v63, %v948_v63  ;;  %v3654_v14 = vcombine.high %v955_v47, %v955_v47 }
 0x1e4   : > { %v624_v25 = vrot.slane %v623_v37, 2  ;;  %v1441_v22 = vrot.slane %v948_v63, %v3564_v62  ;;  %v1445_v54 = vrot.slane %v948_v63, %v3566_v49  ;;  %v1449_v9 = vrot.slane %v956_v20, %v3564_v62 }
 0x1e5   : > { %5515 = vst [vmem:[#allocation32_spill] sm:$0xff] %v3652_v21  ;;  %5516 = vst [vmem:[#allocation33_spill] sm:$0xff] %v3654_v14  ;;  %v1453_v48 = vrot.slane %v956_v20, %v3566_v49  ;;  %v635_v51 = vadd.f32 %v3657_v42, %v634_v34  ;;  %v1465_v24 = vrot.slane %v941_v23, %v3564_v62  ;;  %v5550_v60 = vld [vmem:[#allocation29_spill] sm:$0xff] }
 0x1e6   : > { %v625_v46 = vadd.f32 %v624_v25, %v623_v37  ;;  %v1469_v26 = vrot.slane %v941_v23, %v3566_v49  ;;  %v1473_v25 = vrot.slane %v955_v47, %v3564_v62  ;;  %v1477_v37 = vrot.slane %v955_v47, %v3566_v49 }
 0x1e7   : > { %v1481_v63 = vrot.slane %v957_v4, %v3564_v62  ;;  %v636_v28 = vrot.slane %v635_v51, 4  ;;  %v1485_v20 = vrot.slane %v957_v4, %v3566_v49  ;;  %v3677_v59 = vcombine.low %v1433_v44, %v1437_v16 }
 0x1e8   : > { %v3679_v30 = vcombine.low %v1441_v22, %v1445_v54  ;;  %v3681_v23 = vcombine.low %v1449_v9, %v1453_v48  ;;  %v3683_v33 = vcombine.low %v1465_v24, %v1469_v26  ;;  %v3685_v35 = vcombine.low %v1473_v25, %v1477_v37 }
 0x1e9   : > { %5517 = vst [vmem:[#allocation34_spill] sm:$0xff] %v3677_v59  ;;  %v637_v47 = vadd.f32 %v636_v28, %v635_v51  ;;  %v3687_v38 = vcombine.low %v1481_v63, %v1485_v20  ;;  %v626_v4 = vrot.slane %v625_v46, 1  ;;  %v3691_v34 = vrot.slane %v3590_v56, %v3561_v12 }
 0x1ea   : > { %5518 = vst [vmem:[#allocation35_spill] sm:$0xff] %v3679_v30  ;;  %5519 = vst [vmem:[#allocation36_spill] sm:$0xff] %v3681_v23  ;;  %v3694_v39 = vrot.slane %v726_v58, %v3561_v12  ;;  %v3697_v54 = vrot.slane %v727_v41, %v3561_v12  ;;  %v3701_v24 = vcombine.high %v3642_v29, %v3642_v29 }
 0x1eb   : > { %5520 = vst [vmem:[#allocation37_spill] sm:$0xff] %v3683_v33  ;;  %5521 = vst [vmem:[#allocation38_spill] sm:$0xff] %v3685_v35  ;;  %v638_v26 = vrot.slane %v637_v47, 2  ;;  %v3703_v28 = vadd.f32 %v626_v4, %v625_v46  ;;  %v5524_v48 = vcombine.low %v3532_v32, %v3572_v11  ;;  %v5525_v9 = vcombine.high %v3532_v32, %v3572_v11 }
 0x1ec   : > { %5522 = vst [vmem:[#allocation39_spill] sm:$0xff] %v3687_v38  ;;  %v3715_v41 = vcombine.high %v3691_v34, %v3691_v34  ;;  %v3719_v58 = vcombine.high %v3694_v39, %v3694_v39  ;;  %v3723_v44 = vcombine.high %v3697_v54, %v3697_v54  ;;  %v810_v16 = vcombine.low %v3538_v7, %v3583_v15 }
 0x1ed   : > { %5523 = vst [vmem:[#allocation40_spill] sm:$0xff] %v3703_v28  ;;  %v768_v51 = vrot.slane %v5524_v48, %v3561_v12  ;;  %v775_v56 = vrot.slane %v5525_v9, %v3561_v12  ;;  %v639_v22 = vadd.f32 %v638_v26, %v637_v47  ;;  %v811_v37 = vcombine.high %v3538_v7, %v3583_v15 }
 0x1ee   : > { %v818_v63 = vrot.slane %v810_v16, %v3561_v12  ;;  %v860_v20 = vcombine.low %v3546_v53, %v3604_v17  ;;  %v960_v40 = vcombine.low %v3556_v18, %v3635_v27  ;;  %v1011_v8 = vcombine.high %v3576_v36, %v3647_v50 }
 0x1ef   : > { %v776_v46 = vcombine.high %v768_v51, %v768_v51  ;;  %v777_v25 = vcombine.high %v775_v56, %v775_v56  ;;  %v3728_v11 = vrot.slane %v768_v51, %v3561_v12  ;;  %v3731_v32 = vrot.slane %v775_v56, %v3561_v12 }
 0x1f0   : > { %v640_v4 = vrot.slane %v639_v22, 1  ;;  %v825_v7 = vrot.slane %v811_v37, %v3561_v12  ;;  %v826_v15 = vcombine.high %v818_v63, %v818_v63  ;;  %v3754_v9 = vrot.slane %v818_v63, %v3561_v12 }
 0x1f1   : > { %v3739_v48 = vrot.slane %v776_v46, %v3561_v12  ;;  %v3742_v47 = vrot.slane %v777_v25, %v3561_v12  ;;  %v3746_v26 = vcombine.high %v3728_v11, %v3728_v11  ;;  %v3750_v51 = vcombine.high %v3731_v32, %v3731_v32 }
 0x1f2   : > { %v3756_v56 = vadd.f32 %v640_v4, %v639_v22  ;;  %v861_v25 = vcombine.high %v3546_v53, %v3604_v17  ;;  %v827_v28 = vcombine.high %v825_v7, %v825_v7  ;;  %v3769_v37 = vrot.slane %v825_v7, %v3561_v12 }
 0x1f3   : > { %v3760_v16 = vcombine.high %v3739_v48, %v3739_v48  ;;  %v3764_v46 = vcombine.high %v3742_v47, %v3742_v47  ;;  %v3772_v63 = vrot.slane %v826_v15, %v3561_v12  ;;  %v3776_v22 = vcombine.high %v3754_v9, %v3754_v9 }
 0x1f4   : > { %5526 = vst [vmem:[#allocation41_spill] sm:$0xff] %v3756_v56  ;;  %v868_v4 = vrot.slane %v860_v20, %v3561_v12  ;;  %v875_v56 = vrot.slane %v861_v25, %v3561_v12  ;;  %v961_v53 = vcombine.high %v3556_v18, %v3635_v27  ;;  %v3785_v17 = vrot.slane %v827_v28, %v3561_v12 }
 0x1f5   : > { %v3789_v7 = vcombine.high %v3769_v37, %v3769_v37  ;;  %v3793_v15 = vcombine.high %v3772_v63, %v3772_v63  ;;  %v1010_v20 = vcombine.low %v3576_v36, %v3647_v50  ;;  %v968_v28 = vrot.slane %v960_v40, %v3561_v12 }
 0x1f6   : > { %v876_v25 = vcombine.high %v868_v4, %v868_v4  ;;  %v877_v43 = vcombine.high %v875_v56, %v875_v56  ;;  %v3798_v45 = vrot.slane %v868_v4, %v3561_v12  ;;  %v3801_v27 = vrot.slane %v875_v56, %v3561_v12 }
 0x1f7   : > { %v3805_v18 = vcombine.high %v3785_v17, %v3785_v17  ;;  %v975_v6 = vrot.slane %v961_v53, %v3561_v12  ;;  %v976_v40 = vcombine.high %v968_v28, %v968_v28  ;;  %v3826_v53 = vrot.slane %v968_v28, %v3561_v12 }
 0x1f8   : > { %v3812_v0 = vrot.slane %v876_v25, %v3561_v12  ;;  %v3815_v4 = vrot.slane %v877_v43, %v3561_v12  ;;  %v3819_v56 = vcombine.high %v3798_v45, %v3798_v45  ;;  %v3823_v1 = vcombine.high %v3801_v27, %v3801_v27 }
 0x1f9   : > { %v977_v3 = vcombine.high %v975_v6, %v975_v6  ;;  %v3829_v36 = vrot.slane %v975_v6, %v3561_v12  ;;  %v1018_v25 = vrot.slane %v1010_v20, %v3561_v12  ;;  %v1025_v5 = vrot.slane %v1011_v8, %v3561_v12 }
 0x1fa   : > { %v3833_v43 = vcombine.high %v3812_v0, %v3812_v0  ;;  %v3837_v50 = vcombine.high %v3815_v4, %v3815_v4  ;;  %v3842_v14 = vrot.slane %v976_v40, %v3561_v12  ;;  %v3849_v6 = vcombine.high %v3826_v53, %v3826_v53 }
 0x1fb   : > { %v3845_v28 = vrot.slane %v977_v3, %v3561_v12  ;;  %v3853_v38 = vcombine.high %v3829_v36, %v3829_v36  ;;  %v1026_v35 = vcombine.high %v1018_v25, %v1018_v25  ;;  %v1027_v33 = vcombine.high %v1025_v5, %v1025_v5 }
 0x1fc   : > { %v3856_v20 = vrot.slane %v1018_v25, %v3561_v12  ;;  %v3859_v8 = vrot.slane %v1025_v5, %v3561_v12  ;;  %v3863_v3 = vcombine.high %v3842_v14, %v3842_v14  ;;  %v1060_v21 = vcombine.low %v3598_v13, %v3657_v42 }
 0x1fd   : > { %v3867_v40 = vcombine.high %v3845_v28, %v3845_v28  ;;  %v1061_v23 = vcombine.high %v3598_v13, %v3657_v42  ;;  %v3874_v25 = vrot.slane %v1026_v35, %v3561_v12  ;;  %v3877_v5 = vrot.slane %v1027_v33, %v3561_v12 }
 0x1fe   : > { %5527 = vst [vmem:[#allocation42_spill] sm:$0xff] %v3856_v20  ;;  %5528 = vst [vmem:[#allocation43_spill] sm:$0xff] %v3859_v8  ;;  %v3881_v30 = vcombine.high %v3856_v20, %v3856_v20  ;;  %v3885_v59 = vcombine.high %v3859_v8, %v3859_v8  ;;  %v1068_v2 = vrot.slane %v1060_v21, %v3561_v12 }
 0x1ff   : > { %5529 = vst [vmem:[#allocation44_spill] sm:$0xff] %v3863_v3  ;;  %5530 = vst [vmem:[#allocation45_spill] sm:$0xff] %v3867_v40  ;;  %v1075_v40 = vrot.slane %v1061_v23, %v3561_v12  ;;  %v3895_v33 = vcombine.high %v3874_v25, %v3874_v25  ;;  %v3899_v42 = vcombine.high %v3877_v5, %v3877_v5 }
 0x200   : > { %5531 = vst [vmem:[#allocation46_spill] sm:$0xff] %v3881_v30  ;;  %5532 = vst [vmem:[#allocation47_spill] sm:$0xff] %v3885_v59  ;;  %v1076_v23 = vcombine.high %v1068_v2, %v1068_v2  ;;  %v3906_v13 = vrot.slane %v1068_v2, %v3561_v12  ;;  %v5545_v3 = vmov %v3885_v59  ;;  %v5552_v20 = vrot.slane %v5550_v60, %v3564_v62 }
 0x201   : > { %5533 = vst [vmem:[#allocation48_spill] sm:$0xff] %v3895_v33  ;;  %5534 = vst [vmem:[#allocation49_spill] sm:$0xff] %v3899_v42  ;;  %v1077_v8 = vcombine.high %v1075_v40, %v1075_v40  ;;  %v3909_v35 = vrot.slane %v1075_v40, %v3561_v12  ;;  %v5551_v33 = vrot.slane %v5550_v60, %v3566_v49 }
 0x202   : > { %5535 = vst [vmem:[#allocation50_spill] sm:$0xff] %v3906_v13  ;;  %v3920_v10 = vrot.slane %v1076_v23, %v3561_v12  ;;  %v3927_v40 = vcombine.high %v3906_v13, %v3906_v13  ;;  %v5553_v23 = vrot.slane %v3615_v61, %v3566_v49  ;;  %v5564_v13 = vld [vmem:[#allocation26_spill] sm:$0xff] }
 0x203   : > { %5536 = vst [vmem:[#allocation51_spill] sm:$0xff] %v3909_v35  ;;  %v3923_v2 = vrot.slane %v1077_v8, %v3561_v12  ;;  %v3931_v31 = vcombine.high %v3909_v35, %v3909_v35  ;;  %v5554_v12 = vrot.slane %v3615_v61, %v3564_v62 }
 0x204   : > { %5537 = vst [vmem:[#allocation52_spill] sm:$0xff] %v3920_v10  ;;  %5539 = vst [vmem:[#allocation54_spill] sm:$0xff] %v3927_v40  ;;  %v3943_v8 = vcombine.high %v3920_v10, %v3920_v10  ;;  %v5558_v40 = vld [vmem:[#allocation28_spill] sm:$0xff]  ;;  %v5561_v10 = vld [vmem:[#allocation30_spill] sm:$0xff] }
 0x205   : > { %5538 = vst [vmem:[#allocation53_spill] sm:$0xff] %v3923_v2  ;;  %5540 = vst [vmem:[#allocation55_spill] sm:$0xff] %v3931_v31  ;;  %v3947_v42 = vcombine.high %v3923_v2, %v3923_v2  ;;  %v5544_v21 = vld [vmem:[#allocation43_spill] sm:$0xff]  ;;  %v4195_v31 = vcombine.low %v5552_v20, %v5551_v33  ;;  %v5559_v60 = vrot.slane %v5558_v40, %v3566_v49 }
 0x206   : > { %5541 = vst [vmem:[#allocation56_spill] sm:$0xff] %v3943_v8  ;;  %v5543_v57 = vld [vmem:[#allocation45_spill] sm:$0xff]  ;;  %v5547_v8 = vld [vmem:[#allocation27_spill] sm:$0xff]  ;;  %v5560_v20 = vrot.slane %v5558_v40, %v3564_v62  ;;  %v5562_v61 = vrot.slane %v5561_v10, %v3566_v49  ;;  %v5566_v40 = vrot.slane %v3622_v55, %v3564_v62 }
 0x207   : > { %5542 = vst [vmem:[#allocation57_spill] sm:$0xff] %v3947_v42  ;;  %v5548_v52 = vrot.slane %v5547_v8, %v3566_v49  ;;  %v5549_v30 = vrot.slane %v5547_v8, %v3564_v62  ;;  %v4203_v42 = vcombine.low %v5554_v12, %v5553_v23  ;;  %v5555_v2 = vld [vmem:[#allocation31_spill] sm:$0xff]  ;;  %v5563_v23 = vrot.slane %v5561_v10, %v3564_v62 }
 0x208   : > { %v5546_v59 = vld [vmem:[#allocation49_spill] sm:$0xff]  ;;  %v4219_v33 = vcombine.low %v5560_v20, %v5559_v60  ;;  %v5567_v20 = vrot.slane %v3630_v19, %v3566_v49  ;;  %v5568_v10 = vrot.slane %v3630_v19, %v3564_v62  ;;  %v5574_v19 = vrot.slane %v3701_v24, %v3564_v62 }
 0x209   : > { %v4187_v35 = vcombine.low %v5549_v30, %v5548_v52  ;;  %v5556_v30 = vrot.slane %v5555_v2, %v3566_v49  ;;  %v5557_v52 = vrot.slane %v5555_v2, %v3564_v62  ;;  %v4227_v12 = vcombine.low %v5563_v23, %v5562_v61 }
 0x20a   : > { %v4247_v61 = vcombine.low %v5568_v10, %v5567_v20  ;;  %v5570_v20 = vrot.slane %v3642_v29, %v3564_v62 }
 0x20b   : > { %v4211_v8 = vcombine.low %v5557_v52, %v5556_v30  ;;  %v5565_v52 = vrot.slane %v3622_v55, %v3566_v49  ;;  %v5571_v30 = vrot.slane %v3694_v39, %v3566_v49  ;;  %v5572_v55 = vrot.slane %v3694_v39, %v3564_v62 }
 0x20c   : > { %v5577_v39 = vrot.slane %v3691_v34, %v3566_v49 }
 0x20d   : > { %v4239_v60 = vcombine.low %v5566_v40, %v5565_v52  ;;  %v5569_v40 = vrot.slane %v3642_v29, %v3566_v49  ;;  %v4275_v23 = vcombine.low %v5572_v55, %v5571_v30  ;;  %v5573_v52 = vrot.slane %v3701_v24, %v3566_v49 }
 0x20e   : > { %v5575_v29 = vrot.slane %v3719_v58, %v3566_v49  ;;  %v5578_v30 = vrot.slane %v3691_v34, %v3564_v62  ;;  %v5579_v24 = vrot.slane %v3697_v54, %v3566_v49  ;;  %v5582_v34 = vrot.slane %v3715_v41, %v3564_v62 }
 0x20f   : > { %v4267_v10 = vcombine.low %v5570_v20, %v5569_v40  ;;  %v4283_v2 = vcombine.low %v5574_v19, %v5573_v52  ;;  %v5576_v40 = vrot.slane %v3719_v58, %v3564_v62  ;;  %v5580_v52 = vrot.slane %v3697_v54, %v3564_v62 }
 0x210   : > { %v4299_v55 = vcombine.low %v5578_v30, %v5577_v39  ;;  %v5583_v30 = vrot.slane %v3723_v44, %v3566_v49  ;;  %v5584_v54 = vrot.slane %v3723_v44, %v3564_v62  ;;  %v5590_v44 = vrot.slane %v3746_v26, %v3564_v62 }
 0x211   : > { %v4291_v20 = vcombine.low %v5576_v40, %v5575_v29  ;;  %v4307_v19 = vcombine.low %v5580_v52, %v5579_v24  ;;  %v5581_v40 = vrot.slane %v3715_v41, %v3566_v49  ;;  %v5587_v29 = vrot.slane %v3739_v48, %v3566_v49 }
 0x212   : > { %v4327_v24 = vcombine.low %v5584_v54, %v5583_v30  ;;  %v5586_v30 = vrot.slane %v3728_v11, %v3564_v62  ;;  %v5588_v41 = vrot.slane %v3739_v48, %v3564_v62  ;;  %v5593_v48 = vrot.slane %v3731_v32, %v3566_v49 }
 0x213   : > { %v4319_v39 = vcombine.low %v5582_v34, %v5581_v40  ;;  %v5585_v34 = vrot.slane %v3728_v11, %v3566_v49  ;;  %v5589_v40 = vrot.slane %v3746_v26, %v3566_v49  ;;  %v5591_v11 = vrot.slane %v3760_v16, %v3566_v49 }
 0x214   : > { %v4355_v52 = vcombine.low %v5588_v41, %v5587_v29  ;;  %v5594_v29 = vrot.slane %v3731_v32, %v3564_v62  ;;  %v5595_v26 = vrot.slane %v3742_v47, %v3566_v49  ;;  %v5598_v32 = vrot.slane %v3750_v51, %v3564_v62 }
 0x215   : > { %v4347_v54 = vcombine.low %v5586_v30, %v5585_v34  ;;  %v4363_v58 = vcombine.low %v5590_v44, %v5589_v40  ;;  %v5592_v34 = vrot.slane %v3760_v16, %v3564_v62  ;;  %v5596_v40 = vrot.slane %v3742_v47, %v3564_v62 }
 0x216   : > { %v4379_v41 = vcombine.low %v5594_v29, %v5593_v48  ;;  %v5599_v29 = vrot.slane %v3764_v46, %v3566_v49  ;;  %v5600_v47 = vrot.slane %v3764_v46, %v3564_v62  ;;  %v5606_v46 = vrot.slane %v3776_v22, %v3564_v62 }
 0x217   : > { %v4371_v30 = vcombine.low %v5592_v34, %v5591_v11  ;;  %v4387_v44 = vcombine.low %v5596_v40, %v5595_v26  ;;  %v5597_v34 = vrot.slane %v3750_v51, %v3566_v49  ;;  %v5603_v11 = vrot.slane %v3772_v63, %v3566_v49 }
 0x218   : > { %v4407_v26 = vcombine.low %v5600_v47, %v5599_v29  ;;  %v5602_v29 = vrot.slane %v3754_v9, %v3564_v62  ;;  %v5604_v51 = vrot.slane %v3772_v63, %v3564_v62  ;;  %v5609_v63 = vrot.slane %v3769_v37, %v3566_v49 }
 0x219   : > { %v4399_v48 = vcombine.low %v5598_v32, %v5597_v34  ;;  %v5601_v32 = vrot.slane %v3754_v9, %v3566_v49  ;;  %v5605_v34 = vrot.slane %v3776_v22, %v3566_v49  ;;  %v5607_v9 = vrot.slane %v3793_v15, %v3566_v49 }
 0x21a   : > { %v4435_v40 = vcombine.low %v5604_v51, %v5603_v11  ;;  %v5610_v11 = vrot.slane %v3769_v37, %v3564_v62  ;;  %v5611_v22 = vrot.slane %v3785_v17, %v3566_v49  ;;  %v5614_v37 = vrot.slane %v3789_v7, %v3564_v62 }
 0x21b   : > { %v4427_v47 = vcombine.low %v5602_v29, %v5601_v32  ;;  %v4443_v16 = vcombine.low %v5606_v46, %v5605_v34  ;;  %v5608_v32 = vrot.slane %v3793_v15, %v3564_v62  ;;  %v5612_v34 = vrot.slane %v3785_v17, %v3564_v62 }
 0x21c   : > { %v4459_v51 = vcombine.low %v5610_v11, %v5609_v63  ;;  %v5615_v11 = vrot.slane %v3805_v18, %v3566_v49  ;;  %v5616_v17 = vrot.slane %v3805_v18, %v3564_v62  ;;  %v5622_v18 = vrot.slane %v3819_v56, %v3564_v62 }
 0x21d   : > { %v4451_v29 = vcombine.low %v5608_v32, %v5607_v9  ;;  %v4467_v46 = vcombine.low %v5612_v34, %v5611_v22  ;;  %v5613_v32 = vrot.slane %v3789_v7, %v3566_v49  ;;  %v5619_v9 = vrot.slane %v3812_v0, %v3566_v49 }
 0x21e   : > { %v4487_v22 = vcombine.low %v5616_v17, %v5615_v11  ;;  %v5618_v11 = vrot.slane %v3798_v45, %v3564_v62  ;;  %v5620_v7 = vrot.slane %v3812_v0, %v3564_v62  ;;  %v5627_v0 = vrot.slane %v3801_v27, %v3566_v49 }
 0x21f   : > { %v4479_v63 = vcombine.low %v5614_v37, %v5613_v32  ;;  %v5617_v37 = vrot.slane %v3798_v45, %v3566_v49  ;;  %v5621_v32 = vrot.slane %v3819_v56, %v3566_v49  ;;  %v5624_v45 = vrot.slane %v3833_v43, %v3566_v49 }
 0x220   : > { %v4515_v34 = vcombine.low %v5620_v7, %v5619_v9  ;;  %v5628_v9 = vrot.slane %v3801_v27, %v3564_v62  ;;  %v5630_v56 = vrot.slane %v3815_v4, %v3566_v49  ;;  %v5633_v27 = vrot.slane %v3823_v1, %v3564_v62 }
 0x221   : > { %v4507_v17 = vcombine.low %v5618_v11, %v5617_v37  ;;  %v4523_v15 = vcombine.low %v5622_v18, %v5621_v32  ;;  %v5625_v37 = vrot.slane %v3833_v43, %v3564_v62  ;;  %v5631_v32 = vrot.slane %v3815_v4, %v3564_v62 }
 0x222   : > { %v4539_v7 = vcombine.low %v5628_v9, %v5627_v0  ;;  %v5635_v9 = vrot.slane %v3837_v50, %v3566_v49  ;;  %v5636_v4 = vrot.slane %v3837_v50, %v3564_v62  ;;  %v5652_v50 = vrot.slane %v3842_v14, %v3566_v49 }
 0x223   : > { %5623 = vst [vmem:[#allocation45_spill] sm:$0xff] %v4523_v15  ;;  %v4531_v11 = vcombine.low %v5625_v37, %v5624_v45  ;;  %v4547_v18 = vcombine.low %v5631_v32, %v5630_v56  ;;  %v5632_v37 = vrot.slane %v3823_v1, %v3566_v49  ;;  %v5653_v32 = vrot.slane %v3842_v14, %v3564_v62 }
 0x224   : > { %5629 = vst [vmem:[#allocation47_spill] sm:$0xff] %v4539_v7  ;;  %v4567_v56 = vcombine.low %v5636_v4, %v5635_v9  ;;  %v5647_v4 = vld [vmem:[#allocation33_spill] sm:$0xff] }
 0x225   : > { %5626 = vst [vmem:[#allocation43_spill] sm:$0xff] %v4531_v11  ;;  %v4559_v0 = vcombine.low %v5633_v27, %v5632_v37  ;;  %v5641_v11 = vld [vmem:[#allocation32_spill] sm:$0xff]  ;;  %v5644_v37 = vld [vmem:[#allocation37_spill] sm:$0xff]  ;;  %v5648_v15 = vrot.slane %v5647_v4, %v3566_v49  ;;  %v5649_v43 = vrot.slane %v5647_v4, %v3564_v62  ;;  %v4623_v9 = vcombine.low %v5653_v32, %v5652_v50 }
 0x226   : > { %5637 = vst [vmem:[#allocation27_spill] sm:$0xff] %v4567_v56  ;;  %v5642_v45 = vrot.slane %v5641_v11, %v3566_v49  ;;  %v5643_v1 = vrot.slane %v5641_v11, %v3564_v62  ;;  %v5650_v11 = vrot.slane %v3826_v53, %v3566_v49  ;;  %v5655_v4 = vrot.slane %v3849_v6, %v3564_v62 }
 0x227   : > { %5634 = vst [vmem:[#allocation49_spill] sm:$0xff] %v4559_v0  ;;  %v5645_v0 = vld [vmem:[#allocation38_spill] sm:$0xff]  ;;  %v4607_v56 = vcombine.low %v5649_v43, %v5648_v15  ;;  %v5654_v43 = vrot.slane %v3849_v6, %v3566_v49  ;;  %v5660_v32 = vrot.slane %v3829_v36, %v3566_v49  ;;  %v5661_v50 = vrot.slane %v3829_v36, %v3564_v62 }
 0x228   : > { %v4593_v7 = vcombine.low %v5643_v1, %v5642_v45  ;;  %v5651_v45 = vrot.slane %v3826_v53, %v3564_v62 }
 0x229   : > { %v4633_v53 = vcombine.low %v5655_v4, %v5654_v43  ;;  %v4649_v15 = vcombine.low %v5661_v50, %v5660_v32  ;;  %v5666_v43 = vrot.slane %v3853_v38, %v3566_v49  ;;  %v5667_v4 = vrot.slane %v3853_v38, %v3564_v62  ;;  %v5670_v50 = vld [vmem:[#allocation42_spill] sm:$0xff] }
 0x22a   : > { %v4615_v1 = vcombine.low %v5651_v45, %v5650_v11  ;;  %v5657_v11 = vld [vmem:[#allocation44_spill] sm:$0xff]  ;;  %v5671_v32 = vrot.slane %v5670_v50, %v3566_v49 }
 0x22b   : > { %5656 = vst [vmem:[#allocation29_spill] sm:$0xff] %v4633_v53  ;;  %v5658_v45 = vrot.slane %v5657_v11, %v3566_v49  ;;  %v5659_v27 = vrot.slane %v5657_v11, %v3564_v62  ;;  %5662 = vst [vmem:[#allocation31_spill] sm:$0xff] %v4649_v15  ;;  %v5664_v11 = vrot.slane %v3845_v28, %v3564_v62 }
 0x22c   : > { %v4677_v6 = vcombine.low %v5667_v4, %v5666_v43  ;;  %v5672_v15 = vrot.slane %v5670_v50, %v3564_v62  ;;  %v5674_v43 = vrot.slane %v3874_v25, %v3566_v49  ;;  %v5675_v4 = vrot.slane %v3874_v25, %v3564_v62 }
 0x22d   : > { %v4641_v14 = vcombine.low %v5659_v27, %v5658_v45  ;;  %v5663_v27 = vrot.slane %v3845_v28, %v3566_v49 }
 0x22e   : > { %v4695_v38 = vcombine.low %v5672_v15, %v5671_v32  ;;  %v4703_v28 = vcombine.low %v5675_v4, %v5674_v43  ;;  %v5680_v15 = vld [vmem:[#allocation48_spill] sm:$0xff]  ;;  %v5684_v43 = vrot.slane %v5544_v21, %v3566_v49  ;;  %v5685_v4 = vrot.slane %v5544_v21, %v3564_v62 }
 0x22f   : > { %v4663_v45 = vcombine.low %v5664_v11, %v5663_v27  ;;  %v5668_v27 = vrot.slane %v5543_v57, %v3566_v49  ;;  %v5669_v11 = vrot.slane %v5543_v57, %v3564_v62  ;;  %v5681_v32 = vrot.slane %v5680_v15, %v3566_v49 }
 0x230   : > { %5673 = vst [vmem:[#allocation30_spill] sm:$0xff] %v4695_v38  ;;  %v5682_v53 = vrot.slane %v5680_v15, %v3564_v62  ;;  %v4729_v57 = vcombine.low %v5685_v4, %v5684_v43  ;;  %v5688_v15 = vrot.slane %v3877_v5, %v3564_v62  ;;  %v5695_v4 = vld [vmem:[#allocation50_spill] sm:$0xff] }
 0x231   : > { %5665 = vst [vmem:[#allocation28_spill] sm:$0xff] %v4663_v45  ;;  %v4687_v36 = vcombine.low %v5669_v11, %v5668_v27  ;;  %v5676_v27 = vld [vmem:[#allocation46_spill] sm:$0xff]  ;;  %v5696_v43 = vrot.slane %v5695_v4, %v3566_v49 }
 0x232   : > { %v5677_v11 = vrot.slane %v5676_v27, %v3566_v49  ;;  %v5678_v45 = vrot.slane %v5676_v27, %v3564_v62  ;;  %v4721_v25 = vcombine.low %v5682_v53, %v5681_v32  ;;  %5686 = vst [vmem:[#allocation37_spill] sm:$0xff] %v4729_v57  ;;  %v5687_v53 = vrot.slane %v3877_v5, %v3566_v49 }
 0x233   : > { %v5690_v27 = vrot.slane %v5545_v3, %v3566_v49  ;;  %v5697_v57 = vrot.slane %v5695_v4, %v3564_v62 }
 0x234   : > { %v4713_v50 = vcombine.low %v5678_v45, %v5677_v11  ;;  %5683 = vst [vmem:[#allocation32_spill] sm:$0xff] %v4721_v25  ;;  %v4743_v32 = vcombine.low %v5688_v15, %v5687_v53  ;;  %v5691_v11 = vrot.slane %v5545_v3, %v3564_v62  ;;  %v5693_v53 = vrot.slane %v5546_v59, %v3566_v49 }
 0x235   : > { %v5694_v15 = vrot.slane %v5546_v59, %v3564_v62  ;;  %v4775_v3 = vcombine.low %v5697_v57, %v5696_v43  ;;  %v5705_v57 = vld [vmem:[#allocation56_spill] sm:$0xff] }
 0x236   : > { %5679 = vst [vmem:[#allocation26_spill] sm:$0xff] %v4713_v50  ;;  %5689 = vst [vmem:[#allocation38_spill] sm:$0xff] %v4743_v32  ;;  %v4757_v45 = vcombine.low %v5691_v11, %v5690_v27  ;;  %v5699_v27 = vld [vmem:[#allocation52_spill] sm:$0xff]  ;;  %v5706_v43 = vrot.slane %v5705_v57, %v3566_v49  ;;  %v5707_v25 = vrot.slane %v5705_v57, %v3564_v62  ;;  %v5712_v57 = vld [vmem:[#allocation53_spill] sm:$0xff] }
 0x237   : > { %v4767_v21 = vcombine.low %v5694_v15, %v5693_v53  ;;  %5698 = vst [vmem:[#allocation44_spill] sm:$0xff] %v4775_v3  ;;  %v5700_v11 = vrot.slane %v5699_v27, %v3566_v49  ;;  %v5701_v5 = vrot.slane %v5699_v27, %v3564_v62  ;;  %v5702_v53 = vld [vmem:[#allocation54_spill] sm:$0xff] }
 0x238   : > { %5692 = vst [vmem:[#allocation33_spill] sm:$0xff] %v4757_v45  ;;  %v5703_v15 = vrot.slane %v5702_v53, %v3566_v49  ;;  %v5704_v50 = vrot.slane %v5702_v53, %v3564_v62  ;;  %v4801_v27 = vcombine.low %v5707_v25, %v5706_v43  ;;  %v5713_v25 = vrot.slane %v5712_v57, %v3566_v49  ;;  %v5715_v53 = vld [vmem:[#allocation55_spill] sm:$0xff] }
 0x239   : > { %v4783_v32 = vcombine.low %v5701_v5, %v5700_v11  ;;  %v5708_v5 = vld [vmem:[#allocation51_spill] sm:$0xff]  ;;  %v5714_v43 = vrot.slane %v5712_v57, %v3564_v62 }
 0x23a   : > { %v4793_v4 = vcombine.low %v5704_v50, %v5703_v15  ;;  %v5709_v11 = vrot.slane %v5708_v5, %v3566_v49  ;;  %v5710_v59 = vrot.slane %v5708_v5, %v3564_v62  ;;  %v5716_v15 = vrot.slane %v5715_v53, %v3566_v49 }
 0x23b   : > { %v4823_v38 = vcombine.low %v5714_v43, %v5713_v25  ;;  %v5717_v50 = vrot.slane %v5715_v53, %v3564_v62  ;;  %v5718_v25 = vld [vmem:[#allocation57_spill] sm:$0xff] }
 0x23c   : > { %v4809_v45 = vcombine.low %v5710_v59, %v5709_v11  ;;  %v5719_v43 = vrot.slane %v5718_v25, %v3566_v49  ;;  %v5720_v59 = vrot.slane %v5718_v25, %v3564_v62  ;;  %v5721_v11 = vrot.slane %v4195_v31, %v5564_v13 }
 0x23d   : > { %v4837_v3 = vcombine.low %v5717_v50, %v5716_v15  ;;  %v5723_v50 = vrot.slane %v4211_v8, %v5564_v13  ;;  %v5724_v15 = vrot.slane %v4203_v42, %v5564_v13  ;;  %v5725_v62 = vrot.slane %v4227_v12, %v5564_v13 }
 0x23e   : > { %5711 = vst [vmem:[#allocation42_spill] sm:$0xff] %v4809_v45  ;;  %v4847_v5 = vcombine.low %v5720_v59, %v5719_v43  ;;  %v5722_v45 = vrot.slane %v4187_v35, %v5564_v13  ;;  %v5726_v31 = vrot.slane %v4219_v33, %v5564_v13  ;;  %v5727_v35 = vrot.slane %v4247_v61, %v5564_v13 }
 0x23f   : > { %v2299_v57 = vcombine.low %v5724_v15, %v5723_v50  ;;  %v2253_v49 = vrot.slane %v4837_v3, %v5564_v13  ;;  %v5728_v8 = vrot.slane %v4239_v60, %v5564_v13  ;;  %v5729_v42 = vrot.slane %v4275_v23, %v5564_v13 }
 0x240   : > { %v2298_v53 = vcombine.low %v5722_v45, %v5721_v11  ;;  %v2316_v59 = vcombine.low %v5726_v31, %v5725_v62  ;;  %v5730_v11 = vrot.slane %v4267_v10, %v5564_v13  ;;  %v2261_v12 = vrot.slane %v4847_v5, %v5564_v13 }
 0x241   : > { %v2317_v45 = vcombine.low %v5728_v8, %v5727_v35  ;;  %v4887_v43 = vrot.slane %v2299_v57, %v5564_v13  ;;  %v5731_v60 = vrot.slane %v4291_v20, %v5564_v13  ;;  %v5732_v61 = vrot.slane %v4283_v2, %v5564_v13 }
 0x242   : > { %v2334_v25 = vcombine.low %v5730_v11, %v5729_v42  ;;  %v4884_v33 = vrot.slane %v2298_v53, %v5564_v13  ;;  %v4896_v50 = vrot.slane %v2316_v59, %v5564_v13  ;;  %v5733_v57 = vrot.slane %v4307_v19, %v5564_v13 }
 0x243   : > { %v2335_v23 = vcombine.low %v5732_v61, %v5731_v60  ;;  %v4899_v10 = vrot.slane %v2317_v45, %v5564_v13  ;;  %v5734_v53 = vrot.slane %v4299_v55, %v5564_v13  ;;  %v5735_v59 = vrot.slane %v4327_v24, %v5564_v13 }
 0x244   : > { %v4902_v15 = vrot.slane %v2334_v25, %v5564_v13  ;;  %v2314_v2 = vcombine.low %v4884_v33, %v4887_v43  ;;  %v2315_v62 = vcombine.high %v4884_v33, %v4887_v43  ;;  %v5736_v35 = vrot.slane %v4319_v39, %v5564_v13  ;;  %v5817_v33 = vld [vmem:[#allocation9_spill] sm:$0xff] }
 0x245   : > { %v2352_v20 = vcombine.low %v5734_v53, %v5733_v57  ;;  %v4915_v31 = vrot.slane %v2335_v23, %v5564_v13  ;;  %v2332_v55 = vcombine.low %v4896_v50, %v4899_v10  ;;  %v2333_v8 = vcombine.high %v4896_v50, %v4899_v10 }
 0x246   : > { %v2353_v19 = vcombine.low %v5736_v35, %v5735_v59  ;;  %v5737_v42 = vrot.slane %v4355_v52, %v5564_v13  ;;  %v5738_v11 = vrot.slane %v4347_v54, %v5564_v13  ;;  %v5739_v61 = vrot.slane %v4371_v30, %v5564_v13 }
 0x247   : > { %v4928_v45 = vrot.slane %v2352_v20, %v5564_v13  ;;  %v2350_v39 = vcombine.low %v4902_v15, %v4915_v31  ;;  %v2351_v25 = vcombine.high %v4902_v15, %v4915_v31  ;;  %v5740_v23 = vrot.slane %v4363_v58, %v5564_v13  ;;  %v5825_v31 = vld [vmem:[#allocation12_spill] sm:$0xff] }
 0x248   : > { %v2370_v24 = vcombine.low %v5738_v11, %v5737_v42  ;;  %v4941_v60 = vrot.slane %v2353_v19, %v5564_v13  ;;  %v5741_v54 = vrot.slane %v4387_v44, %v5564_v13  ;;  %v5742_v53 = vrot.slane %v4379_v41, %v5564_v13 }
 0x249   : > { %v2371_v52 = vcombine.low %v5740_v23, %v5739_v61  ;;  %v5743_v59 = vrot.slane %v4407_v26, %v5564_v13  ;;  %v5744_v30 = vrot.slane %v4399_v48, %v5564_v13  ;;  %v5745_v58 = vrot.slane %v4435_v40, %v5564_v13 }
 0x24a   : > { %v4950_v57 = vrot.slane %v2370_v24, %v5564_v13  ;;  %v2388_v20 = vcombine.low %v5742_v53, %v5741_v54  ;;  %v5746_v19 = vrot.slane %v4427_v47, %v5564_v13  ;;  %v2368_v44 = vcombine.low %v4928_v45, %v4941_v60 }
 0x24b   : > { %v2389_v35 = vcombine.low %v5744_v30, %v5743_v59  ;;  %v2369_v41 = vcombine.high %v4928_v45, %v4941_v60  ;;  %v4975_v11 = vrot.slane %v2371_v52, %v5564_v13  ;;  %v5747_v48 = vrot.slane %v4451_v29, %v5564_v13  ;;  %v5766_v30 = vld [vmem:[#allocation35_spill] sm:$0xff] }
 0x24c   : > { %v2406_v42 = vcombine.low %v5746_v19, %v5745_v58  ;;  %v5748_v26 = vrot.slane %v4443_v16, %v5564_v13  ;;  %v4984_v24 = vrot.slane %v2388_v20, %v5564_v13  ;;  %v5749_v23 = vrot.slane %v4467_v46, %v5564_v13 }
 0x24d   : > { %v4987_v47 = vrot.slane %v2389_v35, %v5564_v13  ;;  %v5750_v52 = vrot.slane %v4459_v51, %v5564_v13  ;;  %v2386_v16 = vcombine.low %v4950_v57, %v4975_v11  ;;  %v5751_v20 = vrot.slane %v4487_v22, %v5564_v13 }
 0x24e   : > { %v2407_v40 = vcombine.low %v5748_v26, %v5747_v48  ;;  %v4990_v61 = vrot.slane %v2406_v42, %v5564_v13  ;;  %v5752_v59 = vrot.slane %v4479_v63, %v5564_v13  ;;  %v5753_v58 = vrot.slane %v4515_v34, %v5564_v13  ;;  %v5755_v26 = vld [vmem:[#allocation43_spill] sm:$0xff]  ;;  %v5764_v42 = vld [vmem:[#allocation49_spill] sm:$0xff] }
 0x24f   : > { %v2424_v29 = vcombine.low %v5750_v52, %v5749_v23  ;;  %v5754_v19 = vrot.slane %v4507_v17, %v5564_v13  ;;  %v5757_v23 = vld [vmem:[#allocation45_spill] sm:$0xff]  ;;  %v5759_v17 = vrot.slane %v4547_v18, %v5564_v13  ;;  %v5818_v43 = vunpack.c.l.bf16 %v5817_v33 }
 0x250   : > { %v5003_v53 = vrot.slane %v2407_v40, %v5564_v13  ;;  %v2425_v46 = vcombine.low %v5752_v59, %v5751_v20  ;;  %v5756_v40 = vrot.slane %v5755_v26, %v5564_v13  ;;  %v5758_v52 = vrot.slane %v5757_v23, %v5564_v13  ;;  %v5760_v20 = vld [vmem:[#allocation47_spill] sm:$0xff]  ;;  %v5768_v23 = vld [vmem:[#allocation34_spill] sm:$0xff]  ;;  %v5798_v18 = vld [vmem:[#allocation37_spill] sm:$0xff] }
 0x251   : > { %v5016_v35 = vrot.slane %v2424_v29, %v5564_v13  ;;  %v2442_v22 = vcombine.low %v5754_v19, %v5753_v58  ;;  %v5761_v59 = vrot.slane %v5760_v20, %v5564_v13  ;;  %v5762_v19 = vld [vmem:[#allocation27_spill] sm:$0xff]  ;;  %v5765_v26 = vrot.slane %v5764_v42, %v5564_v13 }
 0x252   : > { %v5029_v48 = vrot.slane %v2425_v46, %v5564_v13  ;;  %v2443_v34 = vcombine.low %v5758_v52, %v5756_v40  ;;  %v5763_v46 = vrot.slane %v5762_v19, %v5564_v13  ;;  %v5767_v40 = vrot.slane %v5766_v30, %v5564_v13 }
 0x253   : > { %v5038_v29 = vrot.slane %v2442_v22, %v5564_v13  ;;  %v2460_v58 = vcombine.low %v5761_v59, %v5759_v17  ;;  %v5769_v22 = vrot.slane %v5768_v23, %v5564_v13  ;;  %v5770_v42 = vrot.slane %v4593_v7, %v5564_v13  ;;  %v5771_v59 = vld [vmem:[#allocation36_spill] sm:$0xff] }
 0x254   : > { %v2461_v63 = vcombine.low %v5765_v26, %v5763_v46  ;;  %v5063_v20 = vrot.slane %v2443_v34, %v5564_v13  ;;  %v5772_v19 = vrot.slane %v5771_v59, %v5564_v13  ;;  %v5773_v34 = vrot.slane %v5645_v0, %v5564_v13 }
 0x255   : > { %v2478_v52 = vcombine.low %v5769_v22, %v5767_v40  ;;  %v5072_v46 = vrot.slane %v2460_v58, %v5564_v13  ;;  %v5774_v23 = vrot.slane %v5644_v37, %v5564_v13  ;;  %v5783_v22 = vld [vmem:[#allocation28_spill] sm:$0xff]  ;;  %v5830_v45 = vunpack.c.h.bf16 %v5825_v31 }
 0x256   : > { %v2479_v30 = vcombine.low %v5772_v19, %v5770_v42  ;;  %v5075_v26 = vrot.slane %v2461_v63, %v5564_v13  ;;  %v5775_v63 = vrot.slane %v4607_v56, %v5564_v13  ;;  %v5831_v60 = vcombine.high %v4984_v24, %v4987_v47 }
 0x257   : > { %v5078_v40 = vrot.slane %v2478_v52, %v5564_v13  ;;  %v2496_v7 = vcombine.low %v5774_v23, %v5773_v34  ;;  %v5776_v52 = vld [vmem:[#allocation39_spill] sm:$0xff]  ;;  %v5779_v23 = vrot.slane %v4615_v1, %v5564_v13  ;;  %v5784_v1 = vrot.slane %v5783_v22, %v5564_v13 }
 0x258   : > { %v5091_v42 = vrot.slane %v2479_v30, %v5564_v13  ;;  %v5777_v59 = vrot.slane %v5776_v52, %v5564_v13  ;;  %v2476_v37 = vcombine.low %v5072_v46, %v5075_v26  ;;  %v2477_v19 = vcombine.high %v5072_v46, %v5075_v26  ;;  %v5781_v26 = vld [vmem:[#allocation29_spill] sm:$0xff] }
 0x259   : > { %v5104_v34 = vrot.slane %v2496_v7, %v5564_v13  ;;  %v5778_v30 = vrot.slane %v4623_v9, %v5564_v13  ;;  %v5780_v46 = vrot.slane %v4641_v14, %v5564_v13  ;;  %v5782_v7 = vrot.slane %v5781_v26, %v5564_v13 }
 0x25a   : > { %v2497_v0 = vcombine.low %v5777_v59, %v5775_v63  ;;  %v2494_v52 = vcombine.low %v5078_v40, %v5091_v42  ;;  %v2495_v63 = vcombine.high %v5078_v40, %v5091_v42  ;;  %v5787_v40 = vrot.slane %v4687_v36, %v5564_v13 }
 0x25b   : > { %v2514_v56 = vcombine.low %v5779_v23, %v5778_v30  ;;  %v2515_v58 = vcombine.low %v5782_v7, %v5780_v46  ;;  %v5785_v30 = vld [vmem:[#allocation31_spill] sm:$0xff]  ;;  %v5788_v42 = vrot.slane %v4677_v6, %v5564_v13  ;;  %v5790_v46 = vld [vmem:[#allocation30_spill] sm:$0xff] }
 0x25c   : > { %v2511_v59 = vrot.slane %v2497_v0, %v5564_v13  ;;  %v5786_v23 = vrot.slane %v5785_v30, %v5564_v13  ;;  %v5789_v0 = vrot.slane %v4703_v28, %v5564_v13  ;;  %v5792_v30 = vld [vmem:[#allocation32_spill] sm:$0xff] }
 0x25d   : > { %v2522_v9 = vrot.slane %v2514_v56, %v5564_v13  ;;  %v2533_v14 = vcombine.low %v5788_v42, %v5787_v40  ;;  %v5791_v56 = vrot.slane %v5790_v46, %v5564_v13  ;;  %v5793_v36 = vrot.slane %v5792_v30, %v5564_v13 }
 0x25e   : > { %v2532_v17 = vcombine.low %v5786_v23, %v5784_v1  ;;  %v2512_v22 = vcombine.low %v5104_v34, %v2511_v59  ;;  %v2513_v7 = vcombine.high %v5104_v34, %v2511_v59  ;;  %v2529_v1 = vrot.slane %v2515_v58, %v5564_v13  ;;  %v5794_v23 = vld [vmem:[#allocation26_spill] sm:$0xff] }
 0x25f   : > { %v2550_v26 = vcombine.low %v5791_v56, %v5789_v0  ;;  %v5795_v6 = vrot.slane %v5794_v23, %v5564_v13  ;;  %v2547_v28 = vrot.slane %v2533_v14, %v5564_v13  ;;  %v5796_v0 = vld [vmem:[#allocation38_spill] sm:$0xff]  ;;  %v5799_v34 = vrot.slane %v5798_v18, %v5564_v13  ;;  %v5801_v23 = vld [vmem:[#allocation33_spill] sm:$0xff]  ;;  %v5804_v18 = vld [vmem:[#allocation44_spill] sm:$0xff] }
 0x260   : > { %v2540_v42 = vrot.slane %v2532_v17, %v5564_v13  ;;  %v5797_v56 = vrot.slane %v5796_v0, %v5564_v13  ;;  %v2530_v59 = vcombine.low %v2522_v9, %v2529_v1  ;;  %v2531_v51 = vcombine.high %v2522_v9, %v2529_v1 }
 0x261   : > { %v2551_v40 = vcombine.low %v5795_v6, %v5793_v36  ;;  %v2558_v46 = vrot.slane %v2550_v26, %v5564_v13  ;;  %v5800_v36 = vrot.slane %v4767_v21, %v5564_v13  ;;  %v5802_v17 = vrot.slane %v5801_v23, %v5564_v13 }
 0x262   : > { %v2568_v58 = vcombine.low %v5799_v34, %v5797_v56  ;;  %v2548_v6 = vcombine.low %v2540_v42, %v2547_v28  ;;  %v2549_v26 = vcombine.high %v2540_v42, %v2547_v28  ;;  %v5803_v0 = vrot.slane %v4783_v32, %v5564_v13 }
 0x263   : > { %v2565_v30 = vrot.slane %v2551_v40, %v5564_v13  ;;  %v2569_v14 = vcombine.low %v5802_v17, %v5800_v36  ;;  %v5805_v56 = vrot.slane %v5804_v18, %v5564_v13  ;;  %v5806_v21 = vrot.slane %v4801_v27, %v5564_v13  ;;  %v5813_v18 = vld [vmem:[#allocation10_spill] sm:$0xff] }
 0x264   : > { %v2576_v54 = vrot.slane %v2568_v58, %v5564_v13  ;;  %v5807_v36 = vrot.slane %v4793_v4, %v5564_v13  ;;  %v5808_v32 = vrot.slane %v4823_v38, %v5564_v13  ;;  %v5809_v58 = vld [vmem:[#allocation42_spill] sm:$0xff]  ;;  %v2605_v27 = vcombine.low %v2253_v49, %v2261_v12 }
 0x265   : > { %v2586_v9 = vcombine.low %v5805_v56, %v5803_v0  ;;  %v2566_v1 = vcombine.low %v2558_v46, %v2565_v30  ;;  %v2567_v40 = vcombine.high %v2558_v46, %v2565_v30  ;;  %v2583_v34 = vrot.slane %v2569_v14, %v5564_v13  ;;  %v5811_v46 = vld [vmem:[#allocation11_spill] sm:$0xff] }
 0x266   : > { %v2587_v42 = vcombine.low %v5807_v36, %v5806_v21  ;;  %v5810_v23 = vrot.slane %v5809_v58, %v5564_v13  ;;  %v5812_v30 = vunpack.c.l.bf16 %v5811_v46  ;;  %v5814_v56 = vunpack.c.l.bf16 %v5813_v18 }
 0x267   : > { %v2594_v28 = vrot.slane %v2586_v9, %v5564_v13  ;;  %v2584_v14 = vcombine.low %v2576_v54, %v2583_v34  ;;  %v2585_v0 = vcombine.high %v2576_v54, %v2583_v34  ;;  %v2619_v3 = vrot.slane %v2605_v27, %v5564_v13 }
 0x268   : > { %v2604_v17 = vcombine.low %v5810_v23, %v5808_v32  ;;  %v2658_v4 = vmul.f32 %v2314_v2, %v5812_v30  ;;  %v2601_v38 = vrot.slane %v2587_v42, %v5564_v13  ;;  %v2659_v5 = vmul.f32 %v2315_v62, %v5814_v56  ;;  %v5819_v62 = vld [vmem:[#allocation8_spill] sm:$0xff]  ;;  %v5832_v30 = vld [vmem:[#allocation23_spill] sm:$0xff] }
 0x269   : > { %v5815_v49 = vunpack.c.h.bf16 %v5811_v46  ;;  %v5816_v2 = vunpack.c.h.bf16 %v5813_v18  ;;  %v5820_v36 = vunpack.c.l.bf16 %v5819_v62  ;;  %v5821_v58 = vunpack.c.h.bf16 %v5817_v33 }
 0x26a   : > { %v2612_v9 = vrot.slane %v2604_v17, %v5564_v13  ;;  %v2602_v34 = vcombine.low %v2594_v28, %v2601_v38  ;;  %v2603_v21 = vcombine.high %v2594_v28, %v2601_v38  ;;  %v2662_v13 = vmul.f32 %v2350_v39, %v5818_v43  ;;  %v5823_v39 = vld [vmem:[#allocation13_spill] sm:$0xff] }
 0x26b   : > { %v2660_v12 = vmul.f32 %v2332_v55, %v5815_v49  ;;  %v2661_v54 = vmul.f32 %v2333_v8, %v5816_v2  ;;  %v2663_v55 = vmul.f32 %v2351_v25, %v5820_v36  ;;  %v2664_v50 = vmul.f32 %v2368_v44, %v5821_v58  ;;  %v5842_v43 = vld [vmem:[#allocation21_spill] sm:$0xff] }
 0x26c   : > { %v2620_v42 = vcombine.low %v2612_v9, %v2619_v3  ;;  %v2621_v32 = vcombine.high %v2612_v9, %v2619_v3  ;;  %v5822_v10 = vunpack.c.h.bf16 %v5819_v62  ;;  %v5824_v28 = vunpack.c.l.bf16 %v5823_v39 }
 0x26d   : > { %v5826_v25 = vunpack.c.l.bf16 %v5825_v31  ;;  %v5827_v23 = vcombine.high %v4950_v57, %v4975_v11  ;;  %v5828_v44 = vunpack.c.h.bf16 %v5823_v39  ;;  %v5829_v27 = vcombine.low %v4984_v24, %v4987_v47  ;;  %v5835_v57 = vld [vmem:[#allocation22_spill] sm:$0xff] }
 0x26e   : > { %v2665_v8 = vmul.f32 %v2369_v41, %v5822_v10  ;;  %v2666_v15 = vmul.f32 %v2386_v16, %v5824_v28  ;;  %v2669_v41 = vmul.f32 %v5831_v60, %v5830_v45  ;;  %v5833_v16 = vunpack.c.l.bf16 %v5832_v30 }
 0x26f   : > { %v2667_v17 = vmul.f32 %v5827_v23, %v5826_v25  ;;  %v2668_v46 = vmul.f32 %v5829_v27, %v5828_v44  ;;  %v5834_v38 = vcombine.low %v4990_v61, %v5003_v53  ;;  %v5836_v11 = vunpack.c.l.bf16 %v5835_v57  ;;  %v5852_v27 = vld [vmem:[#allocation18_spill] sm:$0xff] }
 0x270   : > { %v5837_v56 = vcombine.high %v4990_v61, %v5003_v53  ;;  %v5838_v3 = vunpack.c.h.bf16 %v5832_v30  ;;  %v5839_v49 = vcombine.low %v5016_v35, %v5029_v48  ;;  %v5840_v24 = vunpack.c.h.bf16 %v5835_v57  ;;  %v5845_v61 = vld [vmem:[#allocation20_spill] sm:$0xff] }
 0x271   : > { %v2670_v18 = vmul.f32 %v5834_v38, %v5833_v16  ;;  %v5841_v47 = vcombine.high %v5016_v35, %v5029_v48  ;;  %v5843_v62 = vunpack.c.l.bf16 %v5842_v43  ;;  %v5844_v36 = vcombine.low %v5038_v29, %v5063_v20  ;;  %v5850_v35 = vld [vmem:[#allocation19_spill] sm:$0xff] }
 0x272   : > { %v2671_v9 = vmul.f32 %v5837_v56, %v5836_v11  ;;  %v2672_v2 = vmul.f32 %v5839_v49, %v5838_v3  ;;  %v5846_v53 = vunpack.c.l.bf16 %v5845_v61  ;;  %v5847_v10 = vcombine.high %v5038_v29, %v5063_v20  ;;  %v5856_v29 = vld [vmem:[#allocation17_spill] sm:$0xff]  ;;  %v5858_v56 = vld [vmem:[#allocation16_spill] sm:$0xff] }
 0x273   : > { %v2673_v33 = vmul.f32 %v5841_v47, %v5840_v24  ;;  %v2674_v58 = vmul.f32 %v5844_v36, %v5843_v62  ;;  %v5848_v28 = vunpack.c.h.bf16 %v5842_v43  ;;  %v5849_v25 = vunpack.c.h.bf16 %v5845_v61  ;;  %v5862_v47 = vld [vmem:[#allocation15_spill] sm:$0xff]  ;;  %v5864_v62 = vld [vmem:[#allocation14_spill] sm:$0xff] }
 0x274   : > { %v2675_v39 = vmul.f32 %v5847_v10, %v5846_v53  ;;  %v5851_v48 = vunpack.c.l.bf16 %v5850_v35  ;;  %v5853_v45 = vunpack.c.l.bf16 %v5852_v27  ;;  %v5854_v30 = vunpack.c.h.bf16 %v5850_v35  ;;  %v5868_v10 = vld [vmem:[#allocation25_spill] sm:$0xff] }
 0x275   : > { %v2676_v31 = vmul.f32 %v2476_v37, %v5848_v28  ;;  %v2677_v23 = vmul.f32 %v2477_v19, %v5849_v25  ;;  %v5855_v38 = vunpack.c.h.bf16 %v5852_v27  ;;  %v5857_v20 = vunpack.c.l.bf16 %v5856_v29  ;;  %v5870_v25 = vld [vmem:[#allocation24_spill] sm:$0xff] }
 0x276   : > { %v2678_v44 = vmul.f32 %v2494_v52, %v5851_v48  ;;  %v2679_v60 = vmul.f32 %v2495_v63, %v5853_v45  ;;  %v2680_v16 = vmul.f32 %v2512_v22, %v5854_v30  ;;  %v5859_v37 = vunpack.c.l.bf16 %v5858_v56 }
 0x277   : > { %v2681_v57 = vmul.f32 %v2513_v7, %v5855_v38  ;;  %v2682_v11 = vmul.f32 %v2530_v59, %v5857_v20  ;;  %v5860_v19 = vunpack.c.h.bf16 %v5856_v29  ;;  %v5861_v52 = vunpack.c.h.bf16 %v5858_v56  ;;  %v5874_v38 = vld [vmem:[#allocation40_spill] sm:$0xff]  ;;  %v5875_v56 = vld [vmem:[#allocation41_spill] sm:$0xff] }
 0x278   : > { %v2683_v3 = vmul.f32 %v2531_v51, %v5859_v37  ;;  %v5863_v63 = vunpack.c.l.bf16 %v5862_v47  ;;  %v5865_v22 = vunpack.c.l.bf16 %v5864_v62  ;;  %v5866_v7 = vunpack.c.h.bf16 %v5862_v47 }
 0x279   : > { %v2684_v49 = vmul.f32 %v2548_v6, %v5860_v19  ;;  %v2685_v24 = vmul.f32 %v2549_v26, %v5861_v52  ;;  %v5867_v59 = vunpack.c.h.bf16 %v5864_v62  ;;  %v5869_v51 = vunpack.c.l.bf16 %v5868_v10 }
 0x27a   : > { %v2686_v43 = vmul.f32 %v2566_v1, %v5863_v63  ;;  %v2687_v36 = vmul.f32 %v2567_v40, %v5865_v22  ;;  %v2688_v61 = vmul.f32 %v2584_v14, %v5866_v7  ;;  %v5871_v6 = vunpack.c.l.bf16 %v5870_v25 }
 0x27b   : > { %v2689_v53 = vmul.f32 %v2585_v0, %v5867_v59  ;;  %v2690_v28 = vmul.f32 %v2602_v34, %v5869_v51  ;;  %v5872_v26 = vunpack.c.h.bf16 %v5868_v10  ;;  %v5873_v1 = vunpack.c.h.bf16 %v5870_v25 }
 0x27c   : > { %v2691_v35 = vmul.f32 %v2603_v21, %v5871_v6  ;;  %v2694_v45 = vadd.f32 %v2662_v13, %v2658_v4  ;;  %v2695_v40 = vadd.f32 %v2663_v55, %v2659_v5  ;;  %v2696_v30 = vadd.f32 %v2664_v50, %v2660_v12 }
 0x27d   : > { %v2692_v48 = vmul.f32 %v2620_v42, %v5872_v26  ;;  %v2693_v27 = vmul.f32 %v2621_v32, %v5873_v1  ;;  %v2697_v14 = vadd.f32 %v2665_v8, %v2661_v54  ;;  %3040 = vrcp.f32 %v5874_v38 }
 0x27e   : > { %v2698_v0 = vadd.f32 %v2694_v45, %v2666_v15  ;;  %v2699_v29 = vadd.f32 %v2695_v40, %v2667_v17  ;;  %v2700_v20 = vadd.f32 %v2696_v30, %v2668_v46  ;;  %3042 = vrcp.f32 %v5875_v56 }
 0x27f   : > { %v2701_v34 = vadd.f32 %v2697_v14, %v2669_v41 }
 0x280   : > { %v2702_v21 = vadd.f32 %v2698_v0, %v2670_v18  ;;  %v2703_v37 = vadd.f32 %v2699_v29, %v2671_v9  ;;  %v2704_v19 = vadd.f32 %v2700_v20, %v2672_v2 }
 0x281   : > { %v2705_v42 = vadd.f32 %v2701_v34, %v2673_v33 }
 0x282   : > { %v2706_v52 = vadd.f32 %v2702_v21, %v2674_v58  ;;  %v2707_v47 = vadd.f32 %v2703_v37, %v2675_v39  ;;  %v2708_v4 = vadd.f32 %v2704_v19, %v2676_v31 }
 0x283   : > { %v2709_v5 = vadd.f32 %v2705_v42, %v2677_v23 }
 0x284   : > { %v2710_v12 = vadd.f32 %v2706_v52, %v2678_v44  ;;  %v2711_v54 = vadd.f32 %v2707_v47, %v2679_v60  ;;  %v2712_v13 = vadd.f32 %v2708_v4, %v2680_v16 }
 0x285   : > { %v2713_v55 = vadd.f32 %v2709_v5, %v2681_v57 }
 0x286   : > { %v2714_v32 = vadd.f32 %v2710_v12, %v2682_v11  ;;  %v2715_v50 = vadd.f32 %v2711_v54, %v2683_v3  ;;  %v2716_v8 = vadd.f32 %v2712_v13, %v2684_v49 }
 0x287   : > { %v2717_v15 = vadd.f32 %v2713_v55, %v2685_v24 }
 0x288   : > { %v2718_v17 = vadd.f32 %v2714_v32, %v2686_v43  ;;  %v2719_v46 = vadd.f32 %v2715_v50, %v2687_v36  ;;  %v2720_v41 = vadd.f32 %v2716_v8, %v2688_v61 }
 0x289   : > { %v2721_v18 = vadd.f32 %v2717_v15, %v2689_v53 }
 0x28a   : > { %v3041_v9 = vpop.eup %3040  ;;  %v2722_v2 = vadd.f32 %v2718_v17, %v2690_v28  ;;  %v2723_v33 = vadd.f32 %v2719_v46, %v2691_v35  ;;  %v2724_v58 = vadd.f32 %v2720_v41, %v2692_v48 }
 0x28b   : > { %v2725_v39 = vadd.f32 %v2721_v18, %v2693_v27  ;;  %v3043_v31 = vpop.eup %3042 }
 0x28c   : > { %v2728_v23 = vmul.f32 %v3041_v9, %v2722_v2  ;;  %v2730_v44 = vmul.f32 %v3041_v9, %v2724_v58  ;;  %v2729_v60 = vmul.f32 %v3043_v31, %v2723_v33 }
 0x28d   : > { %v2731_v16 = vmul.f32 %v3043_v31, %v2725_v39 }
 0x28e   : > { %2732 = vst [vmem:[%s206_s18] sm:$0xff] %v2728_v23  ;;  %2734 = vst [vmem:[%s206_s18 + $0x10] sm:$0xff] %v2730_v44 }
 0x28f   : > { %2733 = vst [vmem:[%s206_s18 + $0x8] sm:$0xff] %v2729_v60  ;;  %2735 = vst [vmem:[%s206_s18 + $0x18] sm:$0xff] %v2731_v16 }
 0x290   : > { %3085 = shalt.err (!%p3082_p6)
}
 0x291   : > { %s3086_s24 = scalar_lea.hbm %s5330_s23, 512  ;;  %s3090_s8 = scalar_lea.hbm %s5383_s3, 1024 }
 0x292   : > { %p3087_p4 = scmp.ne.s32.totalorder %s5330_s23, %s3086_s24  ;;  %p3091_p13 = scmp.lt.s32.totalorder %s5330_s23, %s5383_s3 }
 0x293   : > { %p3092_p2 = scmp.lt.s32.totalorder %s3090_s8, %s3086_s24 }
 0x294   : > { %p3088_p7 = pnand %p3087_p4, %p3236_p9 }
 0x295   : > { %p3093_p8 = por %p3092_p2, %p3091_p13 }
 0x296   : > { %p3089_p10 = pneg %p3088_p7 }
 0x298   : > { %p3094_p12 = pnand %p3093_p8, %p3089_p10 }
 0x29a   : > { %3097 = shalt.err (!%p3094_p12)
}
 0x29b   : > { %s3163_s11 = smov 256   ;;  %s3164_s18 = smov 16  }
 0x29c   : > { %2907 = dma.vmem_to_hbm [thread:$0]  (%p3236_p9), %s5332_s19, 512, %s5330_s23, %s2737_s15, %s3163_s11, %s3163_s11, %s3164_s18  }
 0x29d PF: > { %s2767_s21 = sand.u32 1, %s3132_s12   ;;  %p5876_p0 = scmp.ge.s32.totalorder %s3152_s17, 2 }
 0x29e   : > { %s2768_s22 = scalar_lea.sflag [#allocation4], %s2767_s21 }
 0x29f   : > { %p2914_p1 = pnand %p5876_p0, %p3243_p11 }
 0x2a1   : > { %p2915_p3 = pneg %p2914_p1 }
 0x2a3   : > { %3127 = dma.done.wait (%p2915_p3), %s2768_s22, 512  }
 0x2a4   : > { %3129 = vsyncadd (%p2915_p3), %s2768_s22, 4294966784  ;;  %s19_s17 = sadd.s32 1, %s3152_s17   ;;  %s5877_s12 = smov %s3136_s13 }
 0x2a5   : > { %p16_p5 = scmp.ge.s32.totalorder %s19_s17, 4   ;;  %s5878_s13 = smov %s3140_s14 }
 0x2a6   : > { %s5879_s14 = smov %s3241_s26  ;;  %s5880_s15 = smov %s3148_s16 }
 0x2a7   : > { %s5881_s16 = smov %s5883_s20  ;;  %18 = sbr.rel (!%p16_p5) target bundleno = 6 (0x6), region = 79 }
 0x2ac   :  { %2773 = vsyncpa [#allocation3], 1 }
 0x2ad   :  { %2775 = vsyncpa [#allocation3 + $0x1], 1 }
 0x2ae   :  { %2776 = vsyncpa [#allocation4], 1 }
 0x2af   :  { %2778 = vsyncpa [#allocation4 + $0x1], 1 }

</bundles_post_ra>
